<compile_context>
chip_gen: v7x
topology: tpu7x:2x2x1
jax: 0.10.0
libtpu: 0.0.40
codegen_flags: <defaults>
</compile_context>

<pallas_src>
import jax
import jax.numpy as jnp
from jax import lax
from jax.experimental import pallas as pl
from jax.experimental.pallas import tpu as pltpu

C1_PAD = 128            # conv1 Cout padded 96 -> 128 (lane-dense stores / clean K)
C1P = 4 * C1_PAD        # 512: 2x2 output sub-pixels stacked on the channel axis
C2 = 128                # conv2 Cout


# ------------------------------ Pallas kernel --------------------------------
def _fused_conv_kernel(x4_ref, w1_ref, b1_ref, w2_ref, b2_ref, o_ref, y_scr):
    """Per-image fused conv1(+ReLU)+conv2(+ReLU) on the space-to-depth grid.

    x4_ref : (Hb+1, Wb+1, 48)   bf16  s2d input, one zero block of top/left pad
    w1_ref : (4, 48, 512)       bf16  conv1 as 2x2 taps over the s2d grid
    b1_ref : (1, 512)           f32
    w2_ref : (4, 512, 128)      bf16  conv2 as 2x2 taps over the conv1 grid
    b2_ref : (1, 128)           f32
    o_ref  : (Hb, Wb, 128)      f32
    y_scr  : (Hb+1, Wb+1, 512)  f32   conv1 output, VMEM-resident, top/left pad
    """
    Hb1, Wb1, _ = y_scr.shape
    Hb, Wb = Hb1 - 1, Wb1 - 1
    c1p = w1_ref.shape[-1]
    c2 = w2_ref.shape[-1]
    f32 = jnp.float32

    # Row 0 / column 0 of the scratch are conv2's zero padding.
    y_scr[...] = jnp.zeros(y_scr.shape, f32)

    # ---- conv1 + ReLU: 4 shifted matmuls per output block-row ---------------
    def conv1_row(a, carry):
        acc = jnp.zeros((Wb, c1p), f32)
        for da in range(2):
            for db in range(2):
                x_slc = x4_ref[a + da, pl.ds(db, Wb), :]          # (Wb, 48) bf16
                acc += jnp.dot(x_slc, w1_ref[2 * da + db],
                               preferred_element_type=f32)
        y = jnp.maximum(acc + b1_ref[...], 0.0)                   # f32 epilogue
        y_scr[a + 1, pl.ds(1, Wb), :] = y
        return carry

    lax.fori_loop(0, Hb, conv1_row, 0)

    # ---- conv2 + ReLU: input stays resident in VMEM --------------------------
    def conv2_row(i, carry):
        acc = jnp.zeros((Wb, c2), f32)
        for da in range(2):
            for db in range(2):
                y_slc = y_scr[i + da, pl.ds(db, Wb), :].astype(jnp.bfloat16)
                acc += jnp.dot(y_slc, w2_ref[2 * da + db],
                               preferred_element_type=f32)
        z = jnp.maximum(acc + b2_ref[...], 0.0)
        o_ref[i] = z
        return carry

    lax.fori_loop(0, Hb, conv2_row, 0)


# ------------------------------ wrapper glue ----------------------------------
def _space_to_depth_pad(x_nhwc):
    """Factor-4 space-to-depth with one zero block of top/left padding.

    (N, H, W, 3) -> (N, H//4 + 1, W//4 + 1, 48).  Pure layout, no duplication.
    Channel order inside a block is (dr, dc, c) with c fastest.
    """
    N, H, W, C = x_nhwc.shape
    assert H % 4 == 0 and W % 4 == 0, "H, W must be multiples of 4"
    # TODO(synk): H/W not divisible by 4 would need edge-block masking.
    xp = jnp.pad(x_nhwc, ((0, 0), (4, 0), (4, 0), (0, 0)))
    Hb1, Wb1 = H // 4 + 1, W // 4 + 1
    x4 = xp.reshape(N, Hb1, 4, Wb1, 4, C)
    x4 = x4.transpose(0, 1, 3, 2, 4, 5).reshape(N, Hb1, Wb1, 16 * C)
    return x4


def _pack_conv1_weights(w1_oihw, b1):
    """Conv1 (3x3,s2,p1, 3->96) as 2x2 taps over the factor-4 s2d grid.

    Returns w1p (4, 48, 512) and b1p (1, 512).  For tap (da, db) and entry
    [(dr, dc, c), (qr, qc, o)] the original kernel tap is
    kh = 4*da + dr - 3 - 2*qr, kw = 4*db + dc - 3 - 2*qc (zero if out of range).
    """
    co, ci, _, _ = w1_oihw.shape                       # (96, 3, 3, 3)
    w_hwio = jnp.transpose(w1_oihw, (2, 3, 1, 0))      # (3, 3, 3, 96)
    w1p = jnp.zeros((2, 2, 4, 4, ci, 2, 2, C1_PAD), w1_oihw.dtype)
    for qr in range(2):
        for kh in range(3):
            rr = 2 * qr + kh - 1                       # padded row offset in [-1, 3]
            da, dr = (0, 3) if rr < 0 else (1, rr)
            for qc in range(2):
                for kw in range(3):
                    cc = 2 * qc + kw - 1
                    db, dc = (0, 3) if cc < 0 else (1, cc)
                    w1p = w1p.at[da, db, dr, dc, :, qr, qc, :co].set(w_hwio[kh, kw])
    w1p = w1p.reshape(4, 16 * ci, C1P)
    b1p = jnp.tile(jnp.pad(b1, (0, C1_PAD - co)), 4).reshape(1, C1P)
    return w1p, b1p


def _pack_conv2_weights(w2_oihw, b2):
    """Conv2 (3x3,s2,p1, 96->128) as 2x2 taps over the conv1 sub-pixel grid.

    Returns w2p (4, 512, 128) and b2p (1, 128).  Row index (qr, qc, o<128 padded)
    maps to original tap kh = 2*da + qr - 1, kw = 2*db + qc - 1.
    """
    co, ci, _, _ = w2_oihw.shape                       # (128, 96, 3, 3)
    w_hwio = jnp.transpose(w2_oihw, (2, 3, 1, 0))      # (3, 3, 96, 128)
    w2p = jnp.zeros((2, 2, 2, 2, C1_PAD, co), w2_oihw.dtype)
    for kh in range(3):
        da, qr = (kh + 1) // 2, (kh + 1) % 2
        for kw in range(3):
            db, qc = (kw + 1) // 2, (kw + 1) % 2
            w2p = w2p.at[da, db, qr, qc, :ci, :].set(w_hwio[kh, kw])
    w2p = w2p.reshape(4, C1P, co)
    return w2p, b2.reshape(1, co)


def conv2d_process(x_nchw, params, *, compute_dtype=jnp.bfloat16):
    """Forward pass of Conv2dProcess.  NCHW in / NCHW out (PyTorch convention)."""
    w1, b1, w2, b2 = params
    N, Cin, H, W = x_nchw.shape
    assert Cin == 3
    Hb, Wb = H // 4, W // 4
    kin = 16 * Cin

    x_nhwc = jnp.transpose(x_nchw, (0, 2, 3, 1))
    x4 = _space_to_depth_pad(x_nhwc).astype(compute_dtype)     # (N, Hb+1, Wb+1, 48)
    w1p, b1p = _pack_conv1_weights(w1, b1)
    w2p, b2p = _pack_conv2_weights(w2, b2)
    w1p = w1p.astype(compute_dtype)
    w2p = w2p.astype(compute_dtype)
    b1p = b1p.astype(jnp.float32)
    b2p = b2p.astype(jnp.float32)

    isz = jnp.dtype(compute_dtype).itemsize
    flops = 2 * N * Hb * Wb * 4 * (kin * C1P + C1P * C2)
    bytes_accessed = (x4.size * isz + w1p.size * isz + w2p.size * isz
                      + b1p.size * 4 + b2p.size * 4 + N * Hb * Wb * C2 * 4)

    out = pl.pallas_call(
        _fused_conv_kernel,
        out_shape=jax.ShapeDtypeStruct((N, Hb, Wb, C2), jnp.float32),
        grid=(N,),
        in_specs=[
            pl.BlockSpec((None, Hb + 1, Wb + 1, kin), lambda n: (n, 0, 0, 0)),
            pl.BlockSpec((4, kin, C1P), lambda n: (0, 0, 0)),
            pl.BlockSpec((1, C1P), lambda n: (0, 0)),
            pl.BlockSpec((4, C1P, C2), lambda n: (0, 0, 0)),
            pl.BlockSpec((1, C2), lambda n: (0, 0)),
        ],
        out_specs=pl.BlockSpec((None, Hb, Wb, C2), lambda n: (n, 0, 0, 0)),
        scratch_shapes=[pltpu.VMEM((Hb + 1, Wb + 1, C1P), jnp.float32)],
        compiler_params=pltpu.CompilerParams(
            dimension_semantics=("parallel",),          # batch across TCs (v7x)
            vmem_limit_bytes=32 * 1024 * 1024,          # headroom even on v7x 64 MiB
        ),
        cost_estimate=pl.CostEstimate(flops=flops, transcendentals=0,
                                      bytes_accessed=bytes_accessed),
    )(x4, w1p, b1p, w2p, b2p)

    return jnp.transpose(out, (0, 3, 1, 2))             # NHWC -> NCHW


# ------------------------------ references ------------------------------------
def _reference_f32(x_nchw, params):
    w1, b1, w2, b2 = params
    dn = ("NCHW", "OIHW", "NCHW")
    y = lax.conv_general_dilated(x_nchw, w1, (2, 2), [(1, 1), (1, 1)],
                                 dimension_numbers=dn)
    y = jnp.maximum(y + b1[None, :, None, None], 0.0)
    y = lax.conv_general_dilated(y, w2, (2, 2), [(1, 1), (1, 1)],
                                 dimension_numbers=dn)
    return jnp.maximum(y + b2[None, :, None, None], 0.0)


def _reference_bf16(x_nchw, params):
    """Same arithmetic as the kernel: bf16 matmul operands, f32 accumulation."""
    w1, b1, w2, b2 = params
    dn = ("NCHW", "OIHW", "NCHW")
    bf = jnp.bfloat16
    y = lax.conv_general_dilated(x_nchw.astype(bf), w1.astype(bf), (2, 2),
                                 [(1, 1), (1, 1)], dimension_numbers=dn,
                                 preferred_element_type=jnp.float32)
    y = jnp.maximum(y + b1[None, :, None, None], 0.0)
    z = lax.conv_general_dilated(y.astype(bf), w2.astype(bf), (2, 2),
                                 [(1, 1), (1, 1)], dimension_numbers=dn,
                                 preferred_element_type=jnp.float32)
    return jnp.maximum(z + b2[None, :, None, None], 0.0)


# --------------------------------- main ----------------------------------------
if __name__ == "__main__":
    key = jax.random.PRNGKey(0)
    k_x, k_w1, k_b1, k_w2, k_b2 = jax.random.split(key, 5)

    x = jax.random.normal(k_x, (2, 3, 16, 16), dtype=jnp.float32)        # NCHW
    w1 = jax.random.normal(k_w1, (96, 3, 3, 3), dtype=jnp.float32) * 0.05
    b1 = jax.random.normal(k_b1, (96,), dtype=jnp.float32) * 0.05
    w2 = jax.random.normal(k_w2, (128, 96, 3, 3), dtype=jnp.float32) * 0.05
    b2 = jax.random.normal(k_b2, (128,), dtype=jnp.float32) * 0.05
    params = (w1, b1, w2, b2)

    out = jax.block_until_ready(jax.jit(conv2d_process)(x, params))
    assert out.shape == (2, 128, 4, 4), out.shape

    # Tight check against a reference with the SAME precision recipe
    # (bf16 operands, f32 accumulation).
    ref_bf16 = jax.block_until_ready(_reference_bf16(x, params))
    err_c = float(jnp.max(jnp.abs(out - ref_bf16)))
    assert jnp.allclose(out, ref_bf16, rtol=2e-3, atol=2e-3), err_c

    # Semantic check against the pure-f32 module; tolerance reflects bf16
    # operand quantization (accumulation stays f32).
    ref_f32 = jax.block_until_ready(_reference_f32(x, params))
    err_s = float(jnp.max(jnp.abs(out - ref_f32)))
    assert jnp.allclose(out, ref_f32, rtol=2e-2, atol=2e-2), err_s

    print("KERNEL_OK")
</pallas_src>

<mosaic_0001>
module attributes {stable_mosaic.version = 11 : i64} {
  func.func @_fused_conv_kernel(%arg0: i32, %arg1: memref<1x5x5x48xbf16, #tpu.memory_space<vmem>>, %arg2: memref<4x48x512xbf16, #tpu.memory_space<vmem>>, %arg3: memref<1x512xf32, #tpu.memory_space<vmem>>, %arg4: memref<4x512x128xbf16, #tpu.memory_space<vmem>>, %arg5: memref<1x128xf32, #tpu.memory_space<vmem>>, %arg6: memref<1x4x4x128xf32, #tpu.memory_space<vmem>>, %arg7: memref<5x5x512xf32, #tpu.memory_space<vmem>>) attributes {dimension_semantics = [#tpu.dimension_semantics<parallel>], iteration_bounds = array<i64: 2>, scalar_prefetch = 0 : i64, scratch_operands = 1 : i64, tpu.core_type = #tpu.core_type<tc>, window_params = [{transform_indices = @transform_0, window_bounds = array<i64: 1, 5, 5, 48>}, {pipeline_mode = #tpu.pipeline_mode<synchronous>, transform_indices = @transform_1, window_bounds = array<i64: 4, 48, 512>}, {pipeline_mode = #tpu.pipeline_mode<synchronous>, transform_indices = @transform_2, window_bounds = array<i64: 1, 512>}, {pipeline_mode = #tpu.pipeline_mode<synchronous>, transform_indices = @transform_3, window_bounds = array<i64: 4, 512, 128>}, {pipeline_mode = #tpu.pipeline_mode<synchronous>, transform_indices = @transform_4, window_bounds = array<i64: 1, 128>}, {transform_indices = @transform_5, window_bounds = array<i64: 1, 4, 4, 128>}]} {
    %cst = arith.constant 0.000000e+00 : f32
    %0 = vector.broadcast %cst : f32 to vector<5x5x512xf32>
    %c0 = arith.constant 0 : index
    %c0_0 = arith.constant 0 : index
    %c0_1 = arith.constant 0 : index
    %1 = vector.load %arg7[%c0, %c0_0, %c0_1] : memref<5x5x512xf32, #tpu.memory_space<vmem>>, vector<5x5x512xf32>
    tpu.vector_store %arg7[%c0, %c0_0, %c0_1], %0 {strides = array<i32>} : memref<5x5x512xf32, #tpu.memory_space<vmem>>, vector<5x5x512xf32>,
    %c0_i32 = arith.constant 0 : i32
    %c4_i32 = arith.constant 4 : i32
    %2 = arith.addi %c0_i32, %c4_i32 : i32
    %c1_i32 = arith.constant 1 : i32
    scf.for %arg8 = %c0_i32 to %2 step %c1_i32  : i32 {
      %cst_7 = arith.constant 0.000000e+00 : f32
      %4 = vector.broadcast %cst_7 : f32 to vector<4x512xf32>
      %c0_i32_8 = arith.constant 0 : i32
      %5 = arith.addi %arg8, %c0_i32_8 : i32
      %c0_9 = arith.constant 0 : index
      %6 = arith.index_cast %5 : i32 to index
      %c0_10 = arith.constant 0 : index
      %c0_11 = arith.constant 0 : index
      %7 = vector.load %arg1[%c0_9, %6, %c0_10, %c0_11] : memref<1x5x5x48xbf16, #tpu.memory_space<vmem>>, vector<1x1x4x48xbf16>
      %8 = vector.shape_cast %7 : vector<1x1x4x48xbf16> to vector<4x48xbf16>
      %c0_12 = arith.constant 0 : index
      %c0_13 = arith.constant 0 : index
      %c0_14 = arith.constant 0 : index
      %9 = vector.load %arg2[%c0_12, %c0_13, %c0_14] : memref<4x48x512xbf16, #tpu.memory_space<vmem>>, vector<1x48x512xbf16>
      %10 = vector.shape_cast %9 : vector<1x48x512xbf16> to vector<48x512xbf16>
      %cst_15 = arith.constant dense<0.000000e+00> : vector<4x512xf32>
      %11 = tpu.matmul %8, %10, %cst_15 {dimension_numbers = #tpu.dot_dimension_numbers<[1], [0], [0], [1], [0, 0, 1, 1], [], []>} : vector<4x48xbf16>, vector<48x512xbf16>, vector<4x512xf32> -> vector<4x512xf32>
      %12 = arith.addf %4, %11 : vector<4x512xf32>
      %c0_i32_16 = arith.constant 0 : i32
      %13 = arith.addi %arg8, %c0_i32_16 : i32
      %c0_17 = arith.constant 0 : index
      %14 = arith.index_cast %13 : i32 to index
      %c1 = arith.constant 1 : index
      %c0_18 = arith.constant 0 : index
      %15 = vector.load %arg1[%c0_17, %14, %c1, %c0_18] : memref<1x5x5x48xbf16, #tpu.memory_space<vmem>>, vector<1x1x4x48xbf16>
      %16 = vector.shape_cast %15 : vector<1x1x4x48xbf16> to vector<4x48xbf16>
      %c1_19 = arith.constant 1 : index
      %c0_20 = arith.constant 0 : index
      %c0_21 = arith.constant 0 : index
      %17 = vector.load %arg2[%c1_19, %c0_20, %c0_21] : memref<4x48x512xbf16, #tpu.memory_space<vmem>>, vector<1x48x512xbf16>
      %18 = vector.shape_cast %17 : vector<1x48x512xbf16> to vector<48x512xbf16>
      %cst_22 = arith.constant dense<0.000000e+00> : vector<4x512xf32>
      %19 = tpu.matmul %16, %18, %cst_22 {dimension_numbers = #tpu.dot_dimension_numbers<[1], [0], [0], [1], [0, 0, 1, 1], [], []>} : vector<4x48xbf16>, vector<48x512xbf16>, vector<4x512xf32> -> vector<4x512xf32>
      %20 = arith.addf %12, %19 : vector<4x512xf32>
      %c1_i32_23 = arith.constant 1 : i32
      %21 = arith.addi %arg8, %c1_i32_23 : i32
      %c0_24 = arith.constant 0 : index
      %22 = arith.index_cast %21 : i32 to index
      %c0_25 = arith.constant 0 : index
      %c0_26 = arith.constant 0 : index
      %23 = vector.load %arg1[%c0_24, %22, %c0_25, %c0_26] : memref<1x5x5x48xbf16, #tpu.memory_space<vmem>>, vector<1x1x4x48xbf16>
      %24 = vector.shape_cast %23 : vector<1x1x4x48xbf16> to vector<4x48xbf16>
      %c2 = arith.constant 2 : index
      %c0_27 = arith.constant 0 : index
      %c0_28 = arith.constant 0 : index
      %25 = vector.load %arg2[%c2, %c0_27, %c0_28] : memref<4x48x512xbf16, #tpu.memory_space<vmem>>, vector<1x48x512xbf16>
      %26 = vector.shape_cast %25 : vector<1x48x512xbf16> to vector<48x512xbf16>
      %cst_29 = arith.constant dense<0.000000e+00> : vector<4x512xf32>
      %27 = tpu.matmul %24, %26, %cst_29 {dimension_numbers = #tpu.dot_dimension_numbers<[1], [0], [0], [1], [0, 0, 1, 1], [], []>} : vector<4x48xbf16>, vector<48x512xbf16>, vector<4x512xf32> -> vector<4x512xf32>
      %28 = arith.addf %20, %27 : vector<4x512xf32>
      %c1_i32_30 = arith.constant 1 : i32
      %29 = arith.addi %arg8, %c1_i32_30 : i32
      %c0_31 = arith.constant 0 : index
      %30 = arith.index_cast %29 : i32 to index
      %c1_32 = arith.constant 1 : index
      %c0_33 = arith.constant 0 : index
      %31 = vector.load %arg1[%c0_31, %30, %c1_32, %c0_33] : memref<1x5x5x48xbf16, #tpu.memory_space<vmem>>, vector<1x1x4x48xbf16>
      %32 = vector.shape_cast %31 : vector<1x1x4x48xbf16> to vector<4x48xbf16>
      %c3 = arith.constant 3 : index
      %c0_34 = arith.constant 0 : index
      %c0_35 = arith.constant 0 : index
      %33 = vector.load %arg2[%c3, %c0_34, %c0_35] : memref<4x48x512xbf16, #tpu.memory_space<vmem>>, vector<1x48x512xbf16>
      %34 = vector.shape_cast %33 : vector<1x48x512xbf16> to vector<48x512xbf16>
      %cst_36 = arith.constant dense<0.000000e+00> : vector<4x512xf32>
      %35 = tpu.matmul %32, %34, %cst_36 {dimension_numbers = #tpu.dot_dimension_numbers<[1], [0], [0], [1], [0, 0, 1, 1], [], []>} : vector<4x48xbf16>, vector<48x512xbf16>, vector<4x512xf32> -> vector<4x512xf32>
      %36 = arith.addf %28, %35 : vector<4x512xf32>
      %c0_37 = arith.constant 0 : index
      %c0_38 = arith.constant 0 : index
      %37 = vector.load %arg3[%c0_37, %c0_38] : memref<1x512xf32, #tpu.memory_space<vmem>>, vector<1x512xf32>
      %38 = vector.broadcast %37 : vector<1x512xf32> to vector<4x512xf32>
      %39 = arith.addf %36, %38 : vector<4x512xf32>
      %cst_39 = arith.constant 0.000000e+00 : f32
      %40 = vector.broadcast %cst_39 : f32 to vector<4x512xf32>
      %41 = arith.maximumf %39, %40 : vector<4x512xf32>
      %c1_i32_40 = arith.constant 1 : i32
      %42 = arith.addi %arg8, %c1_i32_40 : i32
      %43 = arith.index_cast %42 : i32 to index
      %c1_41 = arith.constant 1 : index
      %c0_42 = arith.constant 0 : index
      %44 = vector.load %arg7[%43, %c1_41, %c0_42] : memref<5x5x512xf32, #tpu.memory_space<vmem>>, vector<1x4x512xf32>
      %45 = vector.shape_cast %44 : vector<1x4x512xf32> to vector<4x512xf32>
      %46 = vector.shape_cast %41 : vector<4x512xf32> to vector<1x4x512xf32>
      tpu.vector_store %arg7[%43, %c1_41, %c0_42], %46 {strides = array<i32>} : memref<5x5x512xf32, #tpu.memory_space<vmem>>, vector<1x4x512xf32>,
    }
    %c4_i32_2 = arith.constant 4 : i32
    %c0_i32_3 = arith.constant 0 : i32
    %c4_i32_4 = arith.constant 4 : i32
    %3 = arith.addi %c0_i32_3, %c4_i32_4 : i32
    %c1_i32_5 = arith.constant 1 : i32
    scf.for %arg8 = %c0_i32_3 to %3 step %c1_i32_5  : i32 {
      %cst_7 = arith.constant 0.000000e+00 : f32
      %4 = vector.broadcast %cst_7 : f32 to vector<4x128xf32>
      %c0_i32_8 = arith.constant 0 : i32
      %5 = arith.addi %arg8, %c0_i32_8 : i32
      %6 = arith.index_cast %5 : i32 to index
      %c0_9 = arith.constant 0 : index
      %c0_10 = arith.constant 0 : index
      %7 = vector.load %arg7[%6, %c0_9, %c0_10] : memref<5x5x512xf32, #tpu.memory_space<vmem>>, vector<1x4x512xf32>
      %8 = vector.shape_cast %7 : vector<1x4x512xf32> to vector<4x512xf32>
      %9 = arith.truncf %8 : vector<4x512xf32> to vector<4x512xbf16>
      %c0_11 = arith.constant 0 : index
      %c0_12 = arith.constant 0 : index
      %c0_13 = arith.constant 0 : index
      %10 = vector.load %arg4[%c0_11, %c0_12, %c0_13] : memref<4x512x128xbf16, #tpu.memory_space<vmem>>, vector<1x512x128xbf16>
      %11 = vector.shape_cast %10 : vector<1x512x128xbf16> to vector<512x128xbf16>
      %cst_14 = arith.constant dense<0.000000e+00> : vector<4x128xf32>
      %12 = tpu.matmul %9, %11, %cst_14 {dimension_numbers = #tpu.dot_dimension_numbers<[1], [0], [0], [1], [0, 0, 1, 1], [], []>} : vector<4x512xbf16>, vector<512x128xbf16>, vector<4x128xf32> -> vector<4x128xf32>
      %13 = arith.addf %4, %12 : vector<4x128xf32>
      %c0_i32_15 = arith.constant 0 : i32
      %14 = arith.addi %arg8, %c0_i32_15 : i32
      %15 = arith.index_cast %14 : i32 to index
      %c1 = arith.constant 1 : index
      %c0_16 = arith.constant 0 : index
      %16 = vector.load %arg7[%15, %c1, %c0_16] : memref<5x5x512xf32, #tpu.memory_space<vmem>>, vector<1x4x512xf32>
      %17 = vector.shape_cast %16 : vector<1x4x512xf32> to vector<4x512xf32>
      %18 = arith.truncf %17 : vector<4x512xf32> to vector<4x512xbf16>
      %c1_17 = arith.constant 1 : index
      %c0_18 = arith.constant 0 : index
      %c0_19 = arith.constant 0 : index
      %19 = vector.load %arg4[%c1_17, %c0_18, %c0_19] : memref<4x512x128xbf16, #tpu.memory_space<vmem>>, vector<1x512x128xbf16>
      %20 = vector.shape_cast %19 : vector<1x512x128xbf16> to vector<512x128xbf16>
      %cst_20 = arith.constant dense<0.000000e+00> : vector<4x128xf32>
      %21 = tpu.matmul %18, %20, %cst_20 {dimension_numbers = #tpu.dot_dimension_numbers<[1], [0], [0], [1], [0, 0, 1, 1], [], []>} : vector<4x512xbf16>, vector<512x128xbf16>, vector<4x128xf32> -> vector<4x128xf32>
      %22 = arith.addf %13, %21 : vector<4x128xf32>
      %c1_i32_21 = arith.constant 1 : i32
      %23 = arith.addi %arg8, %c1_i32_21 : i32
      %24 = arith.index_cast %23 : i32 to index
      %c0_22 = arith.constant 0 : index
      %c0_23 = arith.constant 0 : index
      %25 = vector.load %arg7[%24, %c0_22, %c0_23] : memref<5x5x512xf32, #tpu.memory_space<vmem>>, vector<1x4x512xf32>
      %26 = vector.shape_cast %25 : vector<1x4x512xf32> to vector<4x512xf32>
      %27 = arith.truncf %26 : vector<4x512xf32> to vector<4x512xbf16>
      %c2 = arith.constant 2 : index
      %c0_24 = arith.constant 0 : index
      %c0_25 = arith.constant 0 : index
      %28 = vector.load %arg4[%c2, %c0_24, %c0_25] : memref<4x512x128xbf16, #tpu.memory_space<vmem>>, vector<1x512x128xbf16>
      %29 = vector.shape_cast %28 : vector<1x512x128xbf16> to vector<512x128xbf16>
      %cst_26 = arith.constant dense<0.000000e+00> : vector<4x128xf32>
      %30 = tpu.matmul %27, %29, %cst_26 {dimension_numbers = #tpu.dot_dimension_numbers<[1], [0], [0], [1], [0, 0, 1, 1], [], []>} : vector<4x512xbf16>, vector<512x128xbf16>, vector<4x128xf32> -> vector<4x128xf32>
      %31 = arith.addf %22, %30 : vector<4x128xf32>
      %c1_i32_27 = arith.constant 1 : i32
      %32 = arith.addi %arg8, %c1_i32_27 : i32
      %33 = arith.index_cast %32 : i32 to index
      %c1_28 = arith.constant 1 : index
      %c0_29 = arith.constant 0 : index
      %34 = vector.load %arg7[%33, %c1_28, %c0_29] : memref<5x5x512xf32, #tpu.memory_space<vmem>>, vector<1x4x512xf32>
      %35 = vector.shape_cast %34 : vector<1x4x512xf32> to vector<4x512xf32>
      %36 = arith.truncf %35 : vector<4x512xf32> to vector<4x512xbf16>
      %c3 = arith.constant 3 : index
      %c0_30 = arith.constant 0 : index
      %c0_31 = arith.constant 0 : index
      %37 = vector.load %arg4[%c3, %c0_30, %c0_31] : memref<4x512x128xbf16, #tpu.memory_space<vmem>>, vector<1x512x128xbf16>
      %38 = vector.shape_cast %37 : vector<1x512x128xbf16> to vector<512x128xbf16>
      %cst_32 = arith.constant dense<0.000000e+00> : vector<4x128xf32>
      %39 = tpu.matmul %36, %38, %cst_32 {dimension_numbers = #tpu.dot_dimension_numbers<[1], [0], [0], [1], [0, 0, 1, 1], [], []>} : vector<4x512xbf16>, vector<512x128xbf16>, vector<4x128xf32> -> vector<4x128xf32>
      %40 = arith.addf %31, %39 : vector<4x128xf32>
      %c0_33 = arith.constant 0 : index
      %c0_34 = arith.constant 0 : index
      %41 = vector.load %arg5[%c0_33, %c0_34] : memref<1x128xf32, #tpu.memory_space<vmem>>, vector<1x128xf32>
      %42 = vector.broadcast %41 : vector<1x128xf32> to vector<4x128xf32>
      %43 = arith.addf %40, %42 : vector<4x128xf32>
      %cst_35 = arith.constant 0.000000e+00 : f32
      %44 = vector.broadcast %cst_35 : f32 to vector<4x128xf32>
      %45 = arith.maximumf %43, %44 : vector<4x128xf32>
      %c0_36 = arith.constant 0 : index
      %46 = arith.index_cast %arg8 : i32 to index
      %c0_37 = arith.constant 0 : index
      %c0_38 = arith.constant 0 : index
      %47 = vector.load %arg6[%c0_36, %46, %c0_37, %c0_38] : memref<1x4x4x128xf32, #tpu.memory_space<vmem>>, vector<1x1x4x128xf32>
      %48 = vector.shape_cast %47 : vector<1x1x4x128xf32> to vector<4x128xf32>
      %49 = vector.shape_cast %45 : vector<4x128xf32> to vector<1x1x4x128xf32>
      tpu.vector_store %arg6[%c0_36, %46, %c0_37, %c0_38], %49 {strides = array<i32>} : memref<1x4x4x128xf32, #tpu.memory_space<vmem>>, vector<1x1x4x128xf32>,
    }
    %c4_i32_6 = arith.constant 4 : i32
    return
  }
  func.func @transform_0(%arg0: i32) -> (i32, i32, i32, i32) {
    %c0_i32 = arith.constant 0 : i32
    %c0_i32_0 = arith.constant 0 : i32
    %c0_i32_1 = arith.constant 0 : i32
    %c0_i32_2 = arith.constant 0 : i32
    return %arg0, %c0_i32, %c0_i32_0, %c0_i32_1 : i32, i32, i32, i32
  }
  func.func @transform_1(%arg0: i32) -> (i32, i32, i32) {
    %c0_i32 = arith.constant 0 : i32
    %c0_i32_0 = arith.constant 0 : i32
    %c0_i32_1 = arith.constant 0 : i32
    %c0_i32_2 = arith.constant 0 : i32
    return %c0_i32, %c0_i32_0, %c0_i32_1 : i32, i32, i32
  }
  func.func @transform_2(%arg0: i32) -> (i32, i32) {
    %c0_i32 = arith.constant 0 : i32
    %c0_i32_0 = arith.constant 0 : i32
    %c0_i32_1 = arith.constant 0 : i32
    return %c0_i32, %c0_i32_0 : i32, i32
  }
  func.func @transform_3(%arg0: i32) -> (i32, i32, i32) {
    %c0_i32 = arith.constant 0 : i32
    %c0_i32_0 = arith.constant 0 : i32
    %c0_i32_1 = arith.constant 0 : i32
    %c0_i32_2 = arith.constant 0 : i32
    return %c0_i32, %c0_i32_0, %c0_i32_1 : i32, i32, i32
  }
  func.func @transform_4(%arg0: i32) -> (i32, i32) {
    %c0_i32 = arith.constant 0 : i32
    %c0_i32_0 = arith.constant 0 : i32
    %c0_i32_1 = arith.constant 0 : i32
    return %c0_i32, %c0_i32_0 : i32, i32
  }
  func.func @transform_5(%arg0: i32) -> (i32, i32, i32, i32) {
    %c0_i32 = arith.constant 0 : i32
    %c0_i32_0 = arith.constant 0 : i32
    %c0_i32_1 = arith.constant 0 : i32
    %c0_i32_2 = arith.constant 0 : i32
    return %arg0, %c0_i32, %c0_i32_0, %c0_i32_1 : i32, i32, i32, i32
  }
}

</mosaic_0001>

<bundles_post_ra>
// kernel: tile.8
= control target key start
LH: loop header
LB: loop body
LE: loop exit
PB: predicated region body
PF: predicated region fallthrough
CT: control target
= control target key end

     0   :  { %s22_s0 = inlined_call_operand.vmem [shape: f32[128], index: 0, kind: input, shape index: {}]   ;;  %s23_s1 = inlined_call_operand.vmem [shape: f32[4,128], index: 1, kind: output, shape index: {}]  }
   0x1   :  { %v4_v0 = vld [vmem:[%s22_s0] ss:$0 sm:$0xff] }
   0x2   :  { %5 = vst [vmem:[%s23_s1] sm:$0xf] %v4_v0 }

// kernel: conv2d_process.1
= control target key start
LH: loop header
LB: loop body
LE: loop exit
PB: predicated region body
PF: predicated region fallthrough
CT: control target
= control target key end

     0   :  { %10 = vsyncpa [#allocation4], 0  ;;  %s4252_s0 = inlined_call_operand.vmem [shape: bf16[2,5,5,48], index: 0, kind: input, shape index: {}]   ;;  %s4253_s1 = inlined_call_operand.vmem [shape: bf16[4,48,512], index: 1, kind: input, shape index: {}]   ;;  %s4254_s2 = inlined_call_operand.vmem [shape: f32[1,512], index: 2, kind: input, shape index: {}]   ;;  %s4255_s3 = inlined_call_operand.vmem [shape: bf16[4,512,128], index: 3, kind: input, shape index: {}]   ;;  %s4256_s4 = inlined_call_operand.vmem [shape: f32[1,128], index: 4, kind: input, shape index: {}]   ;;  %s4257_s5 = inlined_call_operand.hbm [shape: f32[2,4,4,128], index: 5, kind: output, shape index: {}]  }
   0x1   :  { %12 = vsyncpa [#allocation4 + $0x1], 0  ;;  %s3539_s18 = smov 0   ;;  %s3541_s19 = smov 0  }
   0x2   :  { %s3543_s20 = smov 0   ;;  %s3545_s21 = smov 0  }
   0x3 LB: > { %s3560_s22 = sadd.s32 4294967295, %s3494_s21   ;;  %s2538_s23 = sadd.s32 4294967294, %s3494_s21   ;;  %s3494_s21 = sphi %s3545_s21, %s4265_s21   ;;  %s3490_s20 = sphi %s3543_s20, %s4264_s20   ;;  %s3486_s19 = sphi %s3541_s19, %s4263_s19   ;;  %s3482_s18 = sphi %s3539_s18, %s4262_s18  }
   0x4   : > { %s3564_s24 = sadd.s32 1, %s3494_s21   ;;  %s135_s25 = sadd.s32 1, %s3490_s20 }
   0x5   : > { %s132_s26 = ssub.s32 %s3494_s21, %s3564_s24  ;;  %p145_p0 = scmp.ne.s32.totalorder %s3490_s20, %s3486_s19 }
   0x6   : > { %p133_p1 = scmp.eq.s32.totalorder %s132_s26, 0  ;;  %p146_p2 = scmp.eq.s32.totalorder %s3560_s22, 1 }
   0x7   : > { %p151_p3 = scmp.ne.s32.totalorder %s3486_s19, %s3482_s18  ;;  %p152_p4 = scmp.eq.s32.totalorder %s2538_s23, 1 }
   0x8   : > { %s3575_s27 = scalar_select %p133_p1, %s3490_s20, %s135_s25  }
   0x9   : > { %p3577_p5 = por %p146_p2, %p145_p0  ;;  %p3581_p6 = por %p152_p4, %p151_p3 }
   0xa   : > { %p2541_p7 = scmp.ge.s32.totalorder %s3494_s21, 1  ;;  %p190_p8 = scmp.lt.s32.totalorder %s3494_s21, 3 }
   0xc   : > { %p191_p9 = pnand %p2541_p7, %p190_p8 }
   0xd   : > { %s4258_s30 = sand.u32 (!%p191_p9), 1, %s3486_s19   ;;  %p218_p10 = scmp.lt.s32.totalorder (!%p191_p9), %s3560_s22, 1  ;;  %v3504_v0 = vmov (!%p191_p9), 0.0  }
   0xe   : > { %194 = sbr.rel (%p191_p9) target bundleno = 667 (0x29b), region = 40  ;;  %s3591_s6 = sshll.u32 (!%p191_p9), %s4258_s30, 4  ;;  %224 = vst [vmem:[#allocation2] sm:$0x1f] (!%p191_p9), %v3504_v0  ;;  %225 = vst [vmem:[#allocation2 + $0x8] sm:$0x1f] (!%p191_p9), %v3504_v0 }
   0xf   : > { %226 = vst [vmem:[#allocation2 + $0x10] sm:$0x1f] (!%p191_p9), %v3504_v0  ;;  %227 = vst [vmem:[#allocation2 + $0x18] sm:$0x1f] (!%p191_p9), %v3504_v0  ;;  %s217_s12 = scalar_lea.vmem (!%p191_p9), [#allocation3], %s3591_s6  ;;  %s3602_s13 = smov (!%p191_p9), 0  }
  0x10   : > { %228 = vst [vmem:[#allocation2 + $0x20] sm:$0x1f] (!%p191_p9), %v3504_v0  ;;  %229 = vst [vmem:[#allocation2 + $0x28] sm:$0x1f] (!%p191_p9), %v3504_v0 }
  0x11   : > { %230 = vst [vmem:[#allocation2 + $0x30] sm:$0x1f] (!%p191_p9), %v3504_v0  ;;  %231 = vst [vmem:[#allocation2 + $0x38] sm:$0x1f] (!%p191_p9), %v3504_v0 }
  0x12   : > { %232 = vst [vmem:[#allocation2 + $0x40] sm:$0x1f] (!%p191_p9), %v3504_v0  ;;  %233 = vst [vmem:[#allocation2 + $0x48] sm:$0x1f] (!%p191_p9), %v3504_v0 }
  0x13   : > { %234 = vst [vmem:[#allocation2 + $0x50] sm:$0x1f] (!%p191_p9), %v3504_v0  ;;  %235 = vst [vmem:[#allocation2 + $0x58] sm:$0x1f] (!%p191_p9), %v3504_v0 }
  0x14   : > { %236 = vst [vmem:[#allocation2 + $0x60] sm:$0x1f] (!%p191_p9), %v3504_v0  ;;  %237 = vst [vmem:[#allocation2 + $0x68] sm:$0x1f] (!%p191_p9), %v3504_v0 }
  0x15   : > { %238 = vst [vmem:[#allocation2 + $0x70] sm:$0x1f] %v3504_v0  ;;  %239 = vst [vmem:[#allocation2 + $0x78] sm:$0x1f] %v3504_v0  ;;  %s219_s7 = scalar_select %p218_p10, %s3560_s22, 1 }
  0x16   : > { %240 = vst [vmem:[#allocation2 + $0x80] sm:$0x1f] %v3504_v0  ;;  %241 = vst [vmem:[#allocation2 + $0x88] sm:$0x1f] %v3504_v0 }
  0x17   : > { %242 = vst [vmem:[#allocation2 + $0x90] sm:$0x1f] %v3504_v0  ;;  %243 = vst [vmem:[#allocation2 + $0x98] sm:$0x1f] %v3504_v0  ;;  %s3162_s8 = smul.u32 20, %s219_s7 }
  0x19   : > { %s3599_s11 = scalar_lea.vmem %s4252_s0, %s3162_s8 }
  0x1a LB: >> { %v3222_v1 = vld [vmem:[%s4253_s1 + $0x64] ss:$16 sps:$4 sm:$0xff]   ;;  %v3224_v2 = vld [vmem:[%s4253_s1 + $0x6c] ss:$16 sps:$4 sm:$0xff]   ;;  %v3505_v3 = vmov 0   ;;  %s2544_s8 = sshll.u32 %s3498_s13, 2  ;;  %s3498_s13 = sphi %s3602_s13, %s249_s13  }
  0x1b   : >> { %385 = vmatprep.mubr.bf16.mxu0 %v3505_v3  ;;  %426 = vmatprep.mubr.bf16.mxu1 %v3505_v3  ;;  %v3226_v4 = vld [vmem:[%s4253_s1 + $0x60] ss:$16 sps:$4 sm:$0xff]   ;;  %v3227_v5 = vld [vmem:[%s4253_s1 + $0x68] ss:$16 sps:$4 sm:$0xff]   ;;  %v3228_v6 = vld [vmem:[%s4253_s1 + $0x84] ss:$16 sps:$4 sm:$0xff]   ;;  %s3635_s26 = scalar_lea.vmem %s3599_s11, %s2544_s8 }
  0x1c   : >> { %353 = vmatprep.subr.bf16.mxu0 %v3222_v1  ;;  %394 = vmatprep.subr.bf16.mxu1 %v3224_v2  ;;  %v3230_v7 = vld [vmem:[%s4253_s1 + $0x8c] ss:$16 sps:$4 sm:$0xff]   ;;  %v3232_v8 = vld [vmem:[%s4253_s1 + $0x80] ss:$16 sps:$4 sm:$0xff]   ;;  %v3233_v9 = vld [vmem:[%s4253_s1 + $0x88] ss:$16 sps:$4 sm:$0xff]  }
  0x1d   : >> { %354 = vmatpush1.bf16.msra.mxu0 %v3226_v4  ;;  %395 = vmatpush1.bf16.msra.mxu1 %v3227_v5  ;;  %v3234_v10 = vld [vmem:[%s4253_s1 + $0xa4] ss:$16 sps:$4 sm:$0xff]   ;;  %v3236_v11 = vld [vmem:[%s4253_s1 + $0xac] ss:$16 sps:$4 sm:$0xff]   ;;  %v3238_v12 = vld [vmem:[%s4253_s1 + $0xa0] ss:$16 sps:$4 sm:$0xff]  }
  0x1e   : >> { %355 = vmatprep.subr.bf16.mxu0 %v3228_v6  ;;  %396 = vmatprep.subr.bf16.mxu1 %v3230_v7  ;;  %v3239_v13 = vld [vmem:[%s4253_s1 + $0xa8] ss:$16 sps:$4 sm:$0xff]   ;;  %v3240_v14 = vld [vmem:[%s3635_s26] ss:$0 sps:$4 sm:$0x77]   ;;  %vm349_vm0 = vcmask 392192  }
  0x1f   : >> { %v3243_v15 = vld [vmem:[%s4253_s1 + $0x4] ss:$16 sps:$4 sm:$0xff]   ;;  %v283_v16 = vshrl.u32 %v3240_v14, 16  ;;  %v285_v17 = vshll.u32 %v3240_v14, 16  ;;  %v3246_v18 = vld [vmem:[%s4253_s1 + $0xc] ss:$16 sps:$4 sm:$0xff]  }
  0x20   : >> { %v3241_v20 = vld [vmem:[%s4253_s1] ss:$16 sps:$4 sm:$0xff]   ;;  %v3244_v21 = vld [vmem:[%s4253_s1 + $0x8] ss:$16 sps:$4 sm:$0xff]   ;;  %v3249_v22 = vld [vmem:[%s4253_s1 + $0x24] ss:$16 sps:$4 sm:$0xff]  }
  0x21   : >> { %356 = vmatpush1.bf16.msra.mxu0 %v3232_v8  ;;  %397 = vmatpush1.bf16.msra.mxu1 %v3233_v9  ;;  %v287_v19 = vrot.slane %v285_v17, 1  ;;  %v3252_v24 = vld [vmem:[%s4253_s1 + $0x2c] ss:$16 sps:$4 sm:$0xff]   ;;  %v3247_v25 = vld [vmem:[%s4253_s1 + $0x20] ss:$16 sps:$4 sm:$0xff]   ;;  %s2642_s10 = sshll.u32 %s3498_s13, 5 }
  0x22   : >> { %357 = vmatprep.subr.bf16.mxu0 %v3234_v10  ;;  %398 = vmatprep.subr.bf16.mxu1 %v3236_v11  ;;  %v3250_v26 = vld [vmem:[%s4253_s1 + $0x28] ss:$16 sps:$4 sm:$0xff]   ;;  %v3255_v27 = vld [vmem:[%s4253_s1 + $0x44] ss:$16 sps:$4 sm:$0xff]   ;;  %v3258_v28 = vld [vmem:[%s4253_s1 + $0x4c] ss:$16 sps:$4 sm:$0xff]  }
  0x23   : >> { %v288_v23 = vor.u32 %v287_v19, %v283_v16  ;;  %v3253_v29 = vld [vmem:[%s4253_s1 + $0x40] ss:$16 sps:$4 sm:$0xff]   ;;  %v3256_v30 = vld [vmem:[%s4253_s1 + $0x48] ss:$16 sps:$4 sm:$0xff]   ;;  %v3261_v31 = vld [vmem:[%s4253_s1 + $0xc4] ss:$16 sps:$4 sm:$0xff]  }
  0x24   : >> { %v3264_v32 = vld [vmem:[%s4253_s1 + $0xcc] ss:$16 sps:$4 sm:$0xff]   ;;  %v252_v33 = vld [vmem:[%s3635_s26] sm:$0x3]  ;;  %v3262_v35 = vld [vmem:[%s4253_s1 + $0xc8] ss:$16 sps:$4 sm:$0xff]  }
  0x25   : >> { %358 = vmatpush1.bf16.msra.mxu0 %v3238_v12  ;;  %399 = vmatpush1.bf16.msra.mxu1 %v3239_v13  ;;  %v3259_v34 = vld [vmem:[%s4253_s1 + $0xc0] ss:$16 sps:$4 sm:$0xff]   ;;  %v3267_v36 = vld [vmem:[%s4253_s1 + $0xe4] ss:$16 sps:$4 sm:$0xff]   ;;  %v3270_v37 = vld [vmem:[%s4253_s1 + $0xec] ss:$16 sps:$4 sm:$0xff]  }
  0x26   : >> { %498 = vmatprep.subr.bf16.mxu0 %v3243_v15  ;;  %539 = vmatprep.subr.bf16.mxu1 %v3246_v18  ;;  %v3265_v38 = vld [vmem:[%s4253_s1 + $0xe0] ss:$16 sps:$4 sm:$0xff]   ;;  %v3268_v39 = vld [vmem:[%s4253_s1 + $0xe8] ss:$16 sps:$4 sm:$0xff]   ;;  %v3273_v40 = vld [vmem:[%s4253_s1 + $0x104] ss:$16 sps:$4 sm:$0xff]   ;;  %v921_v18 = vlaneseq }
  0x27   : >> { %v3276_v41 = vld [vmem:[%s4253_s1 + $0x10c] ss:$16 sps:$4 sm:$0xff]   ;;  %v3271_v42 = vld [vmem:[%s4253_s1 + $0x100] ss:$16 sps:$4 sm:$0xff]   ;;  %v3274_v43 = vld [vmem:[%s4253_s1 + $0x108] ss:$16 sps:$4 sm:$0xff]  }
  0x28   : >> { %2570 = vmatmul.mubr.msk.bf16.vlgmr.msra.gmra.mrb[0].mxu0 %vm349_vm0, %v288_v23  ;;  %2571 = vmatmul.mubr.msk.bf16.vlgmr.msra.gmra.mrb[0].mxu1 %vm349_vm0, %v288_v23  ;;  %v3279_v44 = vld [vmem:[%s4253_s1 + $0x124] ss:$16 sps:$4 sm:$0xff]   ;;  %v3282_v45 = vld [vmem:[%s4253_s1 + $0x12c] ss:$16 sps:$4 sm:$0xff]   ;;  %v3277_v48 = vld [vmem:[%s4253_s1 + $0x120] ss:$16 sps:$4 sm:$0xff]  }
  0x29   : >> { %499 = vmatpush1.bf16.msra.mxu0 %v3241_v20  ;;  %540 = vmatpush1.bf16.msra.mxu1 %v3244_v21  ;;  %v3295_v46 = vld [vmem:[%s3635_s26 + $0x4] ss:$0 sps:$4 sm:$0x77]   ;;  %v3280_v49 = vld [vmem:[%s4253_s1 + $0x128] ss:$16 sps:$4 sm:$0xff]   ;;  %s2490_s14 = scalar_lea.vmem [#allocation2], %s2642_s10 }
  0x2a   : >> { %500 = vmatprep.subr.bf16.mxu0 %v3249_v22  ;;  %541 = vmatprep.subr.bf16.mxu1 %v3252_v24  ;;  %v2587_v47 = vld [vmem:[%s3635_s26 + $0x4] sm:$0x3]  ;;  %v3288_v51 = vld [vmem:[%s4253_s1 + $0x14c] ss:$16 sps:$4 sm:$0xff]   ;;  %v766_v52 = vshll.u32 %v3295_v46, 16  ;;  %v764_v57 = vshrl.u32 %v3295_v46, 16 }
  0x2b   : >> { %530 = vmatprep.mubr.bf16.mxu0 %v3505_v3  ;;  %571 = vmatprep.mubr.bf16.mxu1 %v3505_v3  ;;  %v3285_v50 = vld [vmem:[%s4253_s1 + $0x144] ss:$16 sps:$4 sm:$0xff]   ;;  %v3283_v53 = vld [vmem:[%s4253_s1 + $0x140] ss:$16 sps:$4 sm:$0xff]   ;;  %v3286_v54 = vld [vmem:[%s4253_s1 + $0x148] ss:$16 sps:$4 sm:$0xff]  }
  0x2c   : >> { %v3291_v55 = vld [vmem:[%s4253_s1 + $0x164] ss:$16 sps:$4 sm:$0xff]   ;;  %v3294_v56 = vld [vmem:[%s4253_s1 + $0x16c] ss:$16 sps:$4 sm:$0xff]   ;;  %v768_v58 = vrot.slane %v766_v52, 1  ;;  %s249_s13 = sadd.s32 1, %s3498_s13  }
  0x2d   : >> { %501 = vmatpush1.bf16.msra.mxu0 %v3247_v25  ;;  %542 = vmatpush1.bf16.msra.mxu1 %v3250_v26  ;;  %v3289_v59 = vld [vmem:[%s4253_s1 + $0x160] ss:$16 sps:$4 sm:$0xff]   ;;  %v3292_v60 = vld [vmem:[%s4253_s1 + $0x168] ss:$16 sps:$4 sm:$0xff]   ;;  %p246_p11 = scmp.ge.s32.totalorder %s249_s13, 4  }
  0x2e   : >> { %502 = vmatprep.subr.bf16.mxu0 %v3255_v27  ;;  %543 = vmatprep.subr.bf16.mxu1 %v3258_v28  ;;  %v769_v61 = vor.u32 %v768_v58, %v764_v57  ;;  %s3782_s15 = smov (%p246_p11), 0  }
  0x31   : >> { %503 = vmatpush1.bf16.msra.mxu0 %v3253_v29  ;;  %544 = vmatpush1.bf16.msra.mxu1 %v3256_v30 }
  0x32   : >> { %660 = vmatprep.subr.bf16.mxu0 %v3261_v31  ;;  %701 = vmatprep.subr.bf16.mxu1 %v3264_v32  ;;  %v922_v31 = vshrl.u32 %v921_v18, 7 }
  0x34   : >> { %2584 = vmatmul.mubr.msk.bf16.vlgmr.msra.gmra.mrb[4].mxu0 %vm349_vm0, %v252_v33  ;;  %2585 = vmatmul.mubr.msk.bf16.vlgmr.msra.gmra.mrb[4].mxu1 %vm349_vm0, %v252_v33  ;;  %v923_v32 = vsub.s32 0, %v922_v31  ;;  %v931_v33 = vsub.s32 2, %v922_v31 }
  0x35   : >> { %661 = vmatpush1.bf16.msra.mxu0 %v3259_v34  ;;  %702 = vmatpush1.bf16.msra.mxu1 %v3262_v35  ;;  %v919_v34 = vld [vmem:[%s4254_s2] sm:$0xf]  ;;  %v927_v35 = vsub.s32 1, %v922_v31 }
  0x36   : >> { %662 = vmatprep.subr.bf16.mxu0 %v3267_v36  ;;  %703 = vmatprep.subr.bf16.mxu1 %v3270_v37  ;;  %v935_v36 = vsub.s32 3, %v922_v31  ;;  %v924_v37 = vrot.slane %v919_v34, %v923_v32 }
  0x37   : >> { %692 = vmatprep.mubr.bf16.mxu0 %v3505_v3  ;;  %733 = vmatprep.mubr.bf16.mxu1 %v3505_v3 }
  0x39   : >> { %663 = vmatpush1.bf16.msra.mxu0 %v3265_v38  ;;  %704 = vmatpush1.bf16.msra.mxu1 %v3268_v39  ;;  %v932_v38 = vrot.slane %v919_v34, %v931_v33 }
  0x3a   : >> { %664 = vmatprep.subr.bf16.mxu0 %v3273_v40  ;;  %705 = vmatprep.subr.bf16.mxu1 %v3276_v41  ;;  %v928_v41 = vrot.slane %v919_v34, %v927_v35 }
  0x3d   : >> { %665 = vmatpush1.bf16.msra.mxu0 %v3271_v42  ;;  %706 = vmatpush1.bf16.msra.mxu1 %v3274_v43  ;;  %v936_v42 = vrot.slane %v919_v34, %v935_v36 }
  0x3e   : >> { %833 = vmatprep.subr.bf16.mxu0 %v3279_v44  ;;  %874 = vmatprep.subr.bf16.mxu1 %v3282_v45 }
  0x40   : >> { %2612 = vmatmul.mubr.msk.bf16.vlgmr.msra.gmra.mrb[8].mxu0 %vm349_vm0, %v2587_v47  ;;  %2613 = vmatmul.mubr.msk.bf16.vlgmr.msra.gmra.mrb[8].mxu1 %vm349_vm0, %v2587_v47 }
  0x41   : >> { %834 = vmatpush1.bf16.msra.mxu0 %v3277_v48  ;;  %875 = vmatpush1.bf16.msra.mxu1 %v3280_v49 }
  0x42   : >> { %835 = vmatprep.subr.bf16.mxu0 %v3285_v50  ;;  %876 = vmatprep.subr.bf16.mxu1 %v3288_v51 }
  0x43   : >> { %865 = vmatprep.mubr.bf16.mxu0 %v3505_v3  ;;  %906 = vmatprep.mubr.bf16.mxu1 %v3505_v3 }
  0x45   : >> { %836 = vmatpush1.bf16.msra.mxu0 %v3283_v53  ;;  %877 = vmatpush1.bf16.msra.mxu1 %v3286_v54 }
  0x46   : >> { %837 = vmatprep.subr.bf16.mxu0 %v3291_v55  ;;  %878 = vmatprep.subr.bf16.mxu1 %v3294_v56 }
  0x49   : >> { %838 = vmatpush1.bf16.msra.mxu0 %v3289_v59  ;;  %879 = vmatpush1.bf16.msra.mxu1 %v3292_v60 }
  0x4c   : >> { %2640 = vmatmul.mubr.msk.bf16.vlgmr.msra.gmra.mrb[12].mxu0 %vm349_vm0, %v769_v61  ;;  %2641 = vmatmul.mubr.msk.bf16.vlgmr.msra.gmra.mrb[12].mxu1 %vm349_vm0, %v769_v61 }
  0xfb   : >> { %v387_v62 = vpop.f32.mrb[0].mxu0  ;;  %v428_v63 = vpop.f32.mrb[0].mxu1 }
  0xfc   : >> { %v389_v0 = vpop.f32.mrb[1].mxu0  ;;  %v430_v1 = vpop.f32.mrb[1].mxu1 }
  0xfd   : >> { %v391_v2 = vpop.f32.mrb[2].mxu0  ;;  %v432_v3 = vpop.f32.mrb[2].mxu1 }
  0xfe   : >> { %v392_v4 = vpop.f32.mrb[3].mxu0  ;;  %v433_v5 = vpop.f32.mrb[3].mxu1 }
 0x107   : >> { %v532_v6 = vpop.f32.mrb[4].mxu0  ;;  %v573_v7 = vpop.f32.mrb[4].mxu1 }
 0x108   : >> { %v533_v8 = vadd.f32 %v532_v6, %v387_v62  ;;  %v574_v9 = vadd.f32 %v573_v7, %v428_v63  ;;  %v534_v10 = vpop.f32.mrb[5].mxu0  ;;  %v575_v11 = vpop.f32.mrb[5].mxu1 }
 0x109   : >> { %v535_v12 = vadd.f32 %v534_v10, %v389_v0  ;;  %v576_v13 = vadd.f32 %v575_v11, %v430_v1  ;;  %v536_v14 = vpop.f32.mrb[6].mxu0  ;;  %v577_v15 = vpop.f32.mrb[6].mxu1 }
 0x10a   : >> { %v537_v16 = vpop.f32.mrb[7].mxu0  ;;  %v578_v17 = vpop.f32.mrb[7].mxu1 }
 0x113   : >> { %v694_v19 = vpop.f32.mrb[8].mxu0  ;;  %v735_v20 = vpop.f32.mrb[8].mxu1 }
 0x114   : >> { %v742_v21 = vadd.f32 %v694_v19, %v533_v8  ;;  %v744_v22 = vadd.f32 %v735_v20, %v574_v9  ;;  %v696_v23 = vpop.f32.mrb[9].mxu0  ;;  %v737_v24 = vpop.f32.mrb[9].mxu1 }
 0x115   : >> { %v743_v25 = vadd.f32 %v696_v23, %v535_v12  ;;  %v745_v26 = vadd.f32 %v737_v24, %v576_v13  ;;  %v698_v27 = vpop.f32.mrb[10].mxu0  ;;  %v739_v28 = vpop.f32.mrb[10].mxu1 }
 0x116   : >> { %v699_v29 = vpop.f32.mrb[11].mxu0  ;;  %v740_v30 = vpop.f32.mrb[11].mxu1 }
 0x11f   : >> { %v867_v39 = vpop.f32.mrb[12].mxu0  ;;  %v908_v40 = vpop.f32.mrb[12].mxu1 }
 0x120   : >> { %v915_v43 = vadd.f32 %v867_v39, %v742_v21  ;;  %v917_v44 = vadd.f32 %v908_v40, %v744_v22  ;;  %v869_v45 = vpop.f32.mrb[13].mxu0  ;;  %v910_v46 = vpop.f32.mrb[13].mxu1 }
 0x121   : >> { %v916_v47 = vadd.f32 %v869_v45, %v743_v25  ;;  %v918_v48 = vadd.f32 %v910_v46, %v745_v26  ;;  %v871_v49 = vpop.f32.mrb[14].mxu0  ;;  %v912_v50 = vpop.f32.mrb[14].mxu1 }
 0x122   : >> { %v941_v51 = vadd.f32 %v924_v37, %v915_v43  ;;  %v943_v52 = vadd.f32 %v932_v38, %v917_v44  ;;  %v872_v53 = vpop.f32.mrb[15].mxu0  ;;  %v913_v54 = vpop.f32.mrb[15].mxu1 }
 0x123   : >> { %v942_v55 = vadd.f32 %v928_v41, %v916_v47  ;;  %v944_v56 = vadd.f32 %v936_v42, %v918_v48  ;;  %248 = sbr.rel (!%p246_p11) target bundleno = 26 (0x1a), region = 101 }
 0x124   : >> { %v945_v57 = vmax.f32 %v941_v51, 0.0  ;;  %v947_v58 = vmax.f32 %v943_v52, 0.0 }
 0x125   : >> { %v946_v59 = vmax.f32 %v942_v55, 0.0  ;;  %v948_v60 = vmax.f32 %v944_v56, 0.0 }
 0x126   : >> { %v953_v61 = vrot.slane %v945_v57, 7  ;;  %v955_v62 = vrot.slane %v947_v58, 7 }
 0x127   : >> { %v954_v63 = vrot.slane %v946_v59, 7  ;;  %v956_v0 = vrot.slane %v948_v60, 7 }
 0x128   : >> { %2643 = vst [vmem:[%s2490_s14 + $0x20] sm:$0x1e] %v953_v61  ;;  %2645 = vst [vmem:[%s2490_s14 + $0x30] sm:$0x1e] %v955_v62 }
 0x129   : >> { %2644 = vst [vmem:[%s2490_s14 + $0x28] sm:$0x1e] %v954_v63  ;;  %2646 = vst [vmem:[%s2490_s14 + $0x38] sm:$0x1e] %v956_v0 }
 0x12a LB: >> { %v3296_v1 = vld [vmem:[%s4255_s3 + $0x140] sm:$0xff]   ;;  %v3300_v5 = vld [vmem:[%s4255_s3 + $0x148] sm:$0xff]   ;;  %v3304_v9 = vld [vmem:[%s4255_s3 + $0x150] sm:$0xff]   ;;  %s2984_s8 = sshll.u32 %s3502_s15, 5  ;;  %s2647_s23 = sshll.u32 %s3502_s15, 2  ;;  %s3502_s15 = sphi %s3782_s15, %s973_s15  }
 0x12b   : >> { %v3297_v2 = vld [vmem:[%s4255_s3 + $0x1c0] sm:$0xff]   ;;  %2986 = vmatprep.subr.bf16.mxu0 %v3296_v1  ;;  %v3301_v6 = vld [vmem:[%s4255_s3 + $0x1c8] sm:$0xff]   ;;  %v3305_v10 = vld [vmem:[%s4255_s3 + $0x1d0] sm:$0xff]   ;;  %s3884_s16 = scalar_lea.vmem [#allocation2], %s2984_s8  ;;  %s2435_s8 = scalar_lea.vmem %s217_s12, %s2647_s23 [#allocation3] }
 0x12c   : >> { %v3298_v3 = vld [vmem:[%s4255_s3 + $0x100] sm:$0xff]   ;;  %3008 = vmatprep.subr.bf16.mxu1 %v3297_v2  ;;  %v3302_v7 = vld [vmem:[%s4255_s3 + $0x108] sm:$0xff]   ;;  %v3306_v11 = vld [vmem:[%s4255_s3 + $0x110] sm:$0xff]   ;;  %s973_s15 = sadd.s32 1, %s3502_s15  }
 0x12d   : >> { %v3299_v4 = vld [vmem:[%s4255_s3 + $0x180] sm:$0xff]   ;;  %2987 = vmatpush3.bf16.msra.mxu0 %v3298_v3  ;;  %v3303_v8 = vld [vmem:[%s4255_s3 + $0x188] sm:$0xff]   ;;  %v3307_v12 = vld [vmem:[%s4255_s3 + $0x190] sm:$0xff]   ;;  %p970_p12 = scmp.ge.s32.totalorder %s973_s15, 4  }
 0x12e   : >> { %3009 = vmatpush3.bf16.msra.mxu1 %v3299_v4  ;;  %2988 = vmatprep.subr.bf16.mxu0 %v3300_v5  ;;  %v3308_v13 = vld [vmem:[%s4255_s3 + $0x158] sm:$0xff]   ;;  %v3312_v17 = vld [vmem:[%s4255_s3 + $0x160] sm:$0xff]   ;;  %v3316_v21 = vld [vmem:[%s4255_s3 + $0x168] sm:$0xff]   ;;  %s2985_s25 = sshll.u32 (%p970_p12), %s3560_s22, 8  ;;  %s2451_s30 = sshll.u32 (%p970_p12), %s217_s12, 4  ;;  %s4207_s30 = int_to_ptr.vmem [resolvable:$true] %s2451_s30 }
 0x12f   : >> { %3010 = vmatprep.subr.bf16.mxu1 %v3301_v6  ;;  %v3309_v14 = vld [vmem:[%s4255_s3 + $0x1d8] sm:$0xff]   ;;  %v3313_v18 = vld [vmem:[%s4255_s3 + $0x1e0] sm:$0xff]   ;;  %v3317_v22 = vld [vmem:[%s4255_s3 + $0x1e8] sm:$0xff]   ;;  %s4203_s13 = scalar_lea.hbm (%p970_p12), %s4257_s5, %s2985_s25  ;;  %s4261_s26 = sand.u32 (%p970_p12), 1, %s3486_s19  }
 0x130   : >> { %v3310_v15 = vld [vmem:[%s4255_s3 + $0x118] sm:$0xff]   ;;  %v3314_v19 = vld [vmem:[%s4255_s3 + $0x120] sm:$0xff]   ;;  %v3318_v23 = vld [vmem:[%s4255_s3 + $0x128] sm:$0xff]   ;;  %s4211_s15 = scalar_lea.sflag (%p970_p12), [#allocation4], %s4261_s26  ;;  %s3424_s9 = scalar_lea.vmem (%p970_p12), %s4207_s30, 256 }
 0x131   : >> { %2989 = vmatpush3.bf16.msra.mxu0 %v3302_v7  ;;  %v3311_v16 = vld [vmem:[%s4255_s3 + $0x198] sm:$0xff]   ;;  %v3315_v20 = vld [vmem:[%s4255_s3 + $0x1a0] sm:$0xff]   ;;  %v3319_v24 = vld [vmem:[%s4255_s3 + $0x1a8] sm:$0xff]   ;;  %p3425_p13 = scmp.ne.s32.totalorder (%p970_p12), %s4207_s30, %s3424_s9  ;;  %s3506_s22 = smov (%p970_p12), [#allocation3]  }
 0x132   : >> { %3011 = vmatpush3.bf16.msra.mxu1 %v3303_v8  ;;  %2990 = vmatprep.subr.bf16.mxu0 %v3304_v9  ;;  %v3320_v25 = vld [vmem:[%s4255_s3 + $0x170] sm:$0xff]   ;;  %v3324_v29 = vld [vmem:[%s4255_s3 + $0x178] sm:$0xff]   ;;  %v1050_v33 = vld [vmem:[%s3884_s16 + $0x8] sm:$0x1e]  ;;  %s3428_s10 = sshll.u32 (%p970_p12), %s3506_s22, 4  ;;  %s3429_s10 = int_to_ptr.vmem [resolvable:$false] %s3428_s10 }
 0x133   : >> { %3012 = vmatprep.subr.bf16.mxu1 %v3305_v10  ;;  %v3321_v26 = vld [vmem:[%s4255_s3 + $0x1f0] sm:$0xff]   ;;  %v3325_v30 = vld [vmem:[%s4255_s3 + $0x1f8] sm:$0xff]   ;;  %v1049_v35 = vld [vmem:[%s3884_s16] sm:$0x1e]  ;;  %v1054_v36 = vpack.c.bf16 %v1050_v33, %v1050_v33  ;;  %p3426_p0 = pnand (%p970_p12), %p3425_p13, %p3577_p5  ;;  %s3430_s14 = scalar_lea.vmem (%p970_p12), %s3429_s10, 512 }
 0x134   : >> { %v3322_v27 = vld [vmem:[%s4255_s3 + $0x130] sm:$0xff]   ;;  %v3326_v31 = vld [vmem:[%s4255_s3 + $0x138] sm:$0xff]   ;;  %v1053_v38 = vpack.c.bf16 %v1049_v35, %v1049_v35  ;;  %v3328_v41 = vld [vmem:[%s4255_s3 + $0x40] sm:$0xff]   ;;  %p3431_p2 = scmp.lt.s32.totalorder (%p970_p12), %s4207_s30, %s3429_s10  ;;  %p3432_p3 = scmp.lt.s32.totalorder (%p970_p12), %s3430_s14, %s3424_s9 }
 0x135   : >> { %2991 = vmatpush3.bf16.msra.mxu0 %v3306_v11  ;;  %v3323_v28 = vld [vmem:[%s4255_s3 + $0x1b0] sm:$0xff]   ;;  %v3327_v32 = vld [vmem:[%s4255_s3 + $0x1b8] sm:$0xff]   ;;  %v1130_v42 = vshrl.u32 %v1054_v36, 16  ;;  %v1132_v43 = vshll.u32 %v1054_v36, 16  ;;  %v3329_v46 = vld [vmem:[%s4255_s3 + $0xc0] sm:$0xff]   ;;  %p3427_p1 = pneg (%p970_p12), %p3426_p0 }
 0x136   : >> { %3013 = vmatpush3.bf16.msra.mxu1 %v3307_v12  ;;  %2992 = vmatprep.subr.bf16.mxu0 %v3308_v13  ;;  %v1052_v34 = vld [vmem:[%s3884_s16 + $0x18] sm:$0x1e]  ;;  %v1051_v39 = vld [vmem:[%s3884_s16 + $0x10] sm:$0x1e]  ;;  %v1123_v47 = vshrl.u32 %v1053_v38, 16  ;;  %v1125_v48 = vshll.u32 %v1053_v38, 16  ;;  %p3433_p4 = por (%p970_p12), %p3432_p3, %p3431_p2 }
 0x137   : >> { %3014 = vmatprep.subr.bf16.mxu1 %v3309_v14  ;;  %v1056_v37 = vpack.c.bf16 %v1052_v34, %v1052_v34  ;;  %v1055_v40 = vpack.c.bf16 %v1051_v39, %v1051_v39  ;;  %v1134_v51 = vrot.slane %v1132_v43, 1  ;;  %v3330_v53 = vld [vmem:[%s4255_s3] sm:$0xff]   ;;  %v3332_v57 = vld [vmem:[%s4255_s3 + $0x48] sm:$0xff]   ;;  %v3336_v1 = vld [vmem:[%s4255_s3 + $0x50] sm:$0xff]  }
 0x138   : >> { %v1127_v54 = vrot.slane %v1125_v48, 1  ;;  %v3331_v56 = vld [vmem:[%s4255_s3 + $0x80] sm:$0xff]   ;;  %v3333_v62 = vld [vmem:[%s4255_s3 + $0xc8] sm:$0xff]   ;;  %v3337_v2 = vld [vmem:[%s4255_s3 + $0xd0] sm:$0xff]   ;;  %p3434_p7 = pnand (%p970_p12), %p3433_p4, %p3427_p1 }
 0x139   : >> { %2993 = vmatpush3.bf16.msra.mxu0 %v3310_v15  ;;  %v1144_v44 = vshrl.u32 %v1056_v37, 16  ;;  %v1146_v45 = vshll.u32 %v1056_v37, 16  ;;  %v1137_v49 = vshrl.u32 %v1055_v40, 16  ;;  %v1139_v50 = vshll.u32 %v1055_v40, 16  ;;  %v3334_v63 = vld [vmem:[%s4255_s3 + $0x8] sm:$0xff]   ;;  %v3338_v3 = vld [vmem:[%s4255_s3 + $0x10] sm:$0xff]  }
 0x13a   : >> { %3015 = vmatpush3.bf16.msra.mxu1 %v3311_v16  ;;  %2994 = vmatprep.subr.bf16.mxu0 %v3312_v17  ;;  %v1135_v58 = vor.u32 %v1134_v51, %v1130_v42  ;;  %v1128_v60 = vor.u32 %v1127_v54, %v1123_v47  ;;  %v3335_v0 = vld [vmem:[%s4255_s3 + $0x88] sm:$0xff]   ;;  %v3339_v4 = vld [vmem:[%s4255_s3 + $0x90] sm:$0xff]   ;;  %v3340_v5 = vld [vmem:[%s4255_s3 + $0x58] sm:$0xff]  }
 0x13b   : >> { %3016 = vmatprep.subr.bf16.mxu1 %v3313_v18  ;;  %v1148_v52 = vrot.slane %v1146_v45, 1  ;;  %v1141_v55 = vrot.slane %v1139_v50, 1  ;;  %v3341_v6 = vld [vmem:[%s4255_s3 + $0xd8] sm:$0xff]   ;;  %v3344_v9 = vld [vmem:[%s4255_s3 + $0x60] sm:$0xff]   ;;  %v3348_v13 = vld [vmem:[%s4255_s3 + $0x68] sm:$0xff]  }
 0x13c   : >> { %1378 = vmatprep.mubr.bf16.mxu0 %v1135_v58  ;;  %v3342_v7 = vld [vmem:[%s4255_s3 + $0x18] sm:$0xff]   ;;  %v3345_v10 = vld [vmem:[%s4255_s3 + $0xe0] sm:$0xff]   ;;  %v3349_v14 = vld [vmem:[%s4255_s3 + $0xe8] sm:$0xff]  }
 0x13d   : >> { %2995 = vmatpush3.bf16.msra.mxu0 %v3314_v19  ;;  %v1149_v59 = vor.u32 %v1148_v52, %v1144_v44  ;;  %v1142_v61 = vor.u32 %v1141_v55, %v1137_v49  ;;  %v3343_v8 = vld [vmem:[%s4255_s3 + $0x98] sm:$0xff]   ;;  %v3346_v11 = vld [vmem:[%s4255_s3 + $0x20] sm:$0xff]   ;;  %v3350_v15 = vld [vmem:[%s4255_s3 + $0x28] sm:$0xff]  }
 0x13e   : >> { %3017 = vmatpush3.bf16.msra.mxu1 %v3315_v20  ;;  %2996 = vmatprep.subr.bf16.mxu0 %v3316_v21  ;;  %v3347_v12 = vld [vmem:[%s4255_s3 + $0xa0] sm:$0xff]   ;;  %v3351_v16 = vld [vmem:[%s4255_s3 + $0xa8] sm:$0xff]   ;;  %v3352_v17 = vld [vmem:[%s4255_s3 + $0x70] sm:$0xff]  }
 0x13f   : >> { %3018 = vmatprep.subr.bf16.mxu1 %v3317_v22  ;;  %1418 = vmatprep.mubr.bf16.mxu1 %v1149_v59  ;;  %v3353_v18 = vld [vmem:[%s4255_s3 + $0xf0] sm:$0xff]   ;;  %v3356_v21 = vld [vmem:[%s4255_s3 + $0x78] sm:$0xff]   ;;  %v3362_v35 = vld [vmem:[%s4255_s3 + $0x200] sm:$0xff]  }
 0x140   : >> { %v3354_v19 = vld [vmem:[%s4255_s3 + $0x30] sm:$0xff]   ;;  %v3357_v22 = vld [vmem:[%s4255_s3 + $0xf8] sm:$0xff]   ;;  %v3363_v36 = vld [vmem:[%s4255_s3 + $0x280] sm:$0xff]  }
 0x141   : >> { %2997 = vmatpush3.bf16.msra.mxu0 %v3318_v23  ;;  %v3355_v20 = vld [vmem:[%s4255_s3 + $0xb0] sm:$0xff]   ;;  %v3358_v23 = vld [vmem:[%s4255_s3 + $0x38] sm:$0xff]   ;;  %v3364_v37 = vld [vmem:[%s4255_s3 + $0x248] sm:$0xff]  }
 0x142   : >> { %3019 = vmatpush3.bf16.msra.mxu1 %v3319_v24  ;;  %2998 = vmatprep.subr.bf16.mxu0 %v3320_v25  ;;  %v3359_v24 = vld [vmem:[%s4255_s3 + $0xb8] sm:$0xff]   ;;  %v978_v25 = vld [vmem:[%s3884_s16 + $0x8] sm:$0xf]  ;;  %v3369_v42 = vld [vmem:[%s4255_s3 + $0x2d0] sm:$0xff]  }
 0x143   : >> { %3020 = vmatprep.subr.bf16.mxu1 %v3321_v26  ;;  %v982_v26 = vpack.c.bf16 %v978_v25, %v978_v25  ;;  %v3365_v38 = vld [vmem:[%s4255_s3 + $0x2c8] sm:$0xff]   ;;  %v3370_v43 = vld [vmem:[%s4255_s3 + $0x210] sm:$0xff]   ;;  %v3372_v45 = vld [vmem:[%s4255_s3 + $0x258] sm:$0xff]  }
 0x144   : >> { %v3366_v39 = vld [vmem:[%s4255_s3 + $0x208] sm:$0xff]   ;;  %v3371_v44 = vld [vmem:[%s4255_s3 + $0x290] sm:$0xff]   ;;  %v3374_v47 = vld [vmem:[%s4255_s3 + $0x218] sm:$0xff]  }
 0x145   : >> { %2999 = vmatpush3.bf16.msra.mxu0 %v3322_v27  ;;  %v980_v27 = vld [vmem:[%s3884_s16 + $0x18] sm:$0xf]  ;;  %v3367_v40 = vld [vmem:[%s4255_s3 + $0x288] sm:$0xff]   ;;  %v3376_v49 = vld [vmem:[%s4255_s3 + $0x260] sm:$0xff]  }
 0x146   : >> { %3021 = vmatpush3.bf16.msra.mxu1 %v3323_v28  ;;  %3000 = vmatprep.subr.bf16.mxu0 %v3324_v29  ;;  %v977_v28 = vld [vmem:[%s3884_s16] sm:$0xf]  ;;  %v979_v29 = vld [vmem:[%s3884_s16 + $0x10] sm:$0xf]  ;;  %v3375_v48 = vld [vmem:[%s4255_s3 + $0x298] sm:$0xff]  }
 0x147   : >> { %3022 = vmatprep.subr.bf16.mxu1 %v3325_v30  ;;  %v984_v30 = vpack.c.bf16 %v980_v27, %v980_v27  ;;  %v981_v33 = vpack.c.bf16 %v977_v28, %v977_v28  ;;  %v983_v34 = vpack.c.bf16 %v979_v29, %v979_v29  ;;  %v3377_v50 = vld [vmem:[%s4255_s3 + $0x2e0] sm:$0xff]   ;;  %v3381_v54 = vld [vmem:[%s4255_s3 + $0x2e8] sm:$0xff]   ;;  %v3385_v58 = vld [vmem:[%s4255_s3 + $0x2f0] sm:$0xff]  }
 0x148   : >> { %v3378_v51 = vld [vmem:[%s4255_s3 + $0x220] sm:$0xff]   ;;  %v3382_v55 = vld [vmem:[%s4255_s3 + $0x228] sm:$0xff]   ;;  %v3386_v59 = vld [vmem:[%s4255_s3 + $0x230] sm:$0xff]  }
 0x149   : >> { %3001 = vmatpush3.bf16.msra.mxu0 %v3326_v31  ;;  %v3360_v31 = vld [vmem:[%s4255_s3 + $0x240] sm:$0xff]   ;;  %v3412_v29 = vld [vmem:[%s4255_s3 + $0x368] sm:$0xff]  }
 0x14a   : >> { %3023 = vmatpush3.bf16.msra.mxu1 %v3327_v32  ;;  %3030 = vmatprep.subr.bf16.mxu0 %v3328_v41  ;;  %v3361_v32 = vld [vmem:[%s4255_s3 + $0x2c0] sm:$0xff]   ;;  %v3368_v41 = vld [vmem:[%s4255_s3 + $0x250] sm:$0xff]  }
 0x14b   : >> { %3052 = vmatprep.subr.bf16.mxu1 %v3329_v46  ;;  %v3373_v46 = vld [vmem:[%s4255_s3 + $0x2d8] sm:$0xff]   ;;  %v3379_v52 = vld [vmem:[%s4255_s3 + $0x2a0] sm:$0xff]  }
 0x14c   : >> { %1379 = vmatmul.mubr.bf16.vlgmr.msra.gmra.mrb[0].mxu0 %v1128_v60  ;;  %v3387_v60 = vld [vmem:[%s4255_s3 + $0x2b0] sm:$0xff]   ;;  %v3408_v25 = vld [vmem:[%s4255_s3 + $0x360] sm:$0xff]  }
 0x14d   : >> { %1419 = vmatmul.mubr.bf16.vlgmr.msra.gmra.mrb[0].mxu1 %v1142_v61  ;;  %3031 = vmatpush3.bf16.msra.mxu0 %v3330_v53  ;;  %v3380_v53 = vld [vmem:[%s4255_s3 + $0x268] sm:$0xff]   ;;  %v3388_v61 = vld [vmem:[%s4255_s3 + $0x278] sm:$0xff]   ;;  %v3410_v27 = vld [vmem:[%s4255_s3 + $0x320] sm:$0xff]  }
 0x14e   : >> { %3053 = vmatpush3.bf16.msra.mxu1 %v3331_v56  ;;  %3032 = vmatprep.subr.bf16.mxu0 %v3332_v57  ;;  %v3383_v56 = vld [vmem:[%s4255_s3 + $0x2a8] sm:$0xff]   ;;  %v3384_v57 = vld [vmem:[%s4255_s3 + $0x270] sm:$0xff]   ;;  %v3411_v28 = vld [vmem:[%s4255_s3 + $0x3a0] sm:$0xff]  }
 0x14f   : >> { %3054 = vmatprep.subr.bf16.mxu1 %v3333_v62  ;;  %1650 = vmatprep.mubr.bf16.mxu0 %v982_v26  ;;  %v3389_v62 = vld [vmem:[%s4255_s3 + $0x2f8] sm:$0xff]   ;;  %v3409_v26 = vld [vmem:[%s4255_s3 + $0x3e0] sm:$0xff]  }
 0x150   : >> { %1690 = vmatprep.mubr.bf16.mxu1 %v984_v30  ;;  %v3413_v30 = vld [vmem:[%s4255_s3 + $0x3e8] sm:$0xff]  }
 0x151   : >> { %3033 = vmatpush3.bf16.msra.mxu0 %v3334_v63  ;;  %v3390_v63 = vld [vmem:[%s4255_s3 + $0x238] sm:$0xff]  }
 0x152   : >> { %3055 = vmatpush3.bf16.msra.mxu1 %v3335_v0  ;;  %3034 = vmatprep.subr.bf16.mxu0 %v3336_v1  ;;  %v3391_v0 = vld [vmem:[%s4255_s3 + $0x2b8] sm:$0xff]   ;;  %v2779_v1 = vld [vmem:[%s3884_s16 + $0x28] sm:$0xf] }
 0x153   : >> { %3056 = vmatprep.subr.bf16.mxu1 %v3337_v2  ;;  %v2781_v2 = vld [vmem:[%s3884_s16 + $0x38] sm:$0xf] }
 0x155   : >> { %3035 = vmatpush3.bf16.msra.mxu0 %v3338_v3  ;;  %v2778_v3 = vld [vmem:[%s3884_s16 + $0x20] sm:$0xf] }
 0x156   : >> { %3057 = vmatpush3.bf16.msra.mxu1 %v3339_v4  ;;  %3036 = vmatprep.subr.bf16.mxu0 %v3340_v5  ;;  %v1707_v4 = vpack.c.bf16 %v2779_v1, %v2779_v1  ;;  %v1709_v5 = vpack.c.bf16 %v2781_v2, %v2781_v2 }
 0x157   : >> { %3058 = vmatprep.subr.bf16.mxu1 %v3341_v6  ;;  %v2780_v6 = vld [vmem:[%s3884_s16 + $0x30] sm:$0xf] }
 0x159   : >> { %3037 = vmatpush3.bf16.msra.mxu0 %v3342_v7  ;;  %v1706_v7 = vpack.c.bf16 %v2778_v3, %v2778_v3 }
 0x15a   : >> { %3059 = vmatpush3.bf16.msra.mxu1 %v3343_v8  ;;  %3038 = vmatprep.subr.bf16.mxu0 %v3344_v9  ;;  %v1708_v8 = vpack.c.bf16 %v2780_v6, %v2780_v6  ;;  %v3392_v9 = vld [vmem:[%s4255_s3 + $0x340] sm:$0xff]  }
 0x15b   : >> { %3060 = vmatprep.subr.bf16.mxu1 %v3345_v10  ;;  %v3393_v10 = vld [vmem:[%s4255_s3 + $0x3c0] sm:$0xff]  }
 0x15d   : >> { %3039 = vmatpush3.bf16.msra.mxu0 %v3346_v11  ;;  %v3394_v11 = vld [vmem:[%s4255_s3 + $0x300] sm:$0xff]  }
 0x15e   : >> { %3061 = vmatpush3.bf16.msra.mxu1 %v3347_v12  ;;  %3040 = vmatprep.subr.bf16.mxu0 %v3348_v13  ;;  %v3395_v12 = vld [vmem:[%s4255_s3 + $0x380] sm:$0xff]   ;;  %v3396_v13 = vld [vmem:[%s4255_s3 + $0x348] sm:$0xff]  }
 0x15f   : >> { %3062 = vmatprep.subr.bf16.mxu1 %v3349_v14  ;;  %v3397_v14 = vld [vmem:[%s4255_s3 + $0x3c8] sm:$0xff]  }
 0x161   : >> { %3041 = vmatpush3.bf16.msra.mxu0 %v3350_v15  ;;  %v3398_v15 = vld [vmem:[%s4255_s3 + $0x308] sm:$0xff]  }
 0x162   : >> { %3063 = vmatpush3.bf16.msra.mxu1 %v3351_v16  ;;  %3042 = vmatprep.subr.bf16.mxu0 %v3352_v17  ;;  %v3399_v16 = vld [vmem:[%s4255_s3 + $0x388] sm:$0xff]   ;;  %v3400_v17 = vld [vmem:[%s4255_s3 + $0x350] sm:$0xff]  }
 0x163   : >> { %3064 = vmatprep.subr.bf16.mxu1 %v3353_v18  ;;  %v3401_v18 = vld [vmem:[%s4255_s3 + $0x3d0] sm:$0xff]  }
 0x165   : >> { %3043 = vmatpush3.bf16.msra.mxu0 %v3354_v19  ;;  %v3402_v19 = vld [vmem:[%s4255_s3 + $0x310] sm:$0xff]  }
 0x166   : >> { %3065 = vmatpush3.bf16.msra.mxu1 %v3355_v20  ;;  %3044 = vmatprep.subr.bf16.mxu0 %v3356_v21  ;;  %v3403_v20 = vld [vmem:[%s4255_s3 + $0x390] sm:$0xff]   ;;  %v3404_v21 = vld [vmem:[%s4255_s3 + $0x358] sm:$0xff]  }
 0x167   : >> { %3066 = vmatprep.subr.bf16.mxu1 %v3357_v22  ;;  %v3405_v22 = vld [vmem:[%s4255_s3 + $0x3d8] sm:$0xff]  }
 0x169   : >> { %3045 = vmatpush3.bf16.msra.mxu0 %v3358_v23  ;;  %v3406_v23 = vld [vmem:[%s4255_s3 + $0x318] sm:$0xff]  }
 0x16a   : >> { %3067 = vmatpush3.bf16.msra.mxu1 %v3359_v24  ;;  %3074 = vmatprep.subr.bf16.mxu0 %v3360_v31  ;;  %v3407_v24 = vld [vmem:[%s4255_s3 + $0x398] sm:$0xff]   ;;  %v3414_v31 = vld [vmem:[%s4255_s3 + $0x328] sm:$0xff]  }
 0x16b   : >> { %3096 = vmatprep.subr.bf16.mxu1 %v3361_v32  ;;  %v3415_v32 = vld [vmem:[%s4255_s3 + $0x3a8] sm:$0xff]  }
 0x16c   : >> { %1651 = vmatmul.mubr.bf16.vlgmr.msra.gmra.mrb[4].mxu0 %v981_v33  ;;  %v3416_v33 = vld [vmem:[%s4255_s3 + $0x370] sm:$0xff]  }
 0x16d   : >> { %1691 = vmatmul.mubr.bf16.vlgmr.msra.gmra.mrb[4].mxu1 %v983_v34  ;;  %3075 = vmatpush3.bf16.msra.mxu0 %v3362_v35  ;;  %v3417_v34 = vld [vmem:[%s4255_s3 + $0x3f0] sm:$0xff]  }
 0x16e   : >> { %3097 = vmatpush3.bf16.msra.mxu1 %v3363_v36  ;;  %3076 = vmatprep.subr.bf16.mxu0 %v3364_v37  ;;  %v3418_v35 = vld [vmem:[%s4255_s3 + $0x330] sm:$0xff]   ;;  %v3420_v37 = vld [vmem:[%s4255_s3 + $0x378] sm:$0xff]  }
 0x16f   : >> { %3098 = vmatprep.subr.bf16.mxu1 %v3365_v38  ;;  %1999 = vmatprep.mubr.bf16.mxu0 %v1707_v4  ;;  %v3419_v36 = vld [vmem:[%s4255_s3 + $0x3b0] sm:$0xff]   ;;  %v3421_v38 = vld [vmem:[%s4255_s3 + $0x3f8] sm:$0xff]  }
 0x170   : >> { %2039 = vmatprep.mubr.bf16.mxu1 %v1709_v5 }
 0x171   : >> { %3077 = vmatpush3.bf16.msra.mxu0 %v3366_v39  ;;  %v3422_v39 = vld [vmem:[%s4255_s3 + $0x338] sm:$0xff]  }
 0x172   : >> { %3099 = vmatpush3.bf16.msra.mxu1 %v3367_v40  ;;  %3078 = vmatprep.subr.bf16.mxu0 %v3368_v41  ;;  %v3423_v40 = vld [vmem:[%s4255_s3 + $0x3b8] sm:$0xff]   ;;  %v2879_v41 = vld [vmem:[%s3884_s16 + $0x28] sm:$0x1e] }
 0x173   : >> { %3100 = vmatprep.subr.bf16.mxu1 %v3369_v42  ;;  %v2881_v42 = vld [vmem:[%s3884_s16 + $0x38] sm:$0x1e] }
 0x175   : >> { %3079 = vmatpush3.bf16.msra.mxu0 %v3370_v43  ;;  %v2053_v43 = vpack.c.bf16 %v2879_v41, %v2879_v41 }
 0x176   : >> { %3101 = vmatpush3.bf16.msra.mxu1 %v3371_v44  ;;  %3080 = vmatprep.subr.bf16.mxu0 %v3372_v45  ;;  %v2055_v44 = vpack.c.bf16 %v2881_v42, %v2881_v42  ;;  %v2878_v45 = vld [vmem:[%s3884_s16 + $0x20] sm:$0x1e] }
 0x177   : >> { %3102 = vmatprep.subr.bf16.mxu1 %v3373_v46  ;;  %v2880_v46 = vld [vmem:[%s3884_s16 + $0x30] sm:$0x1e] }
 0x179   : >> { %3081 = vmatpush3.bf16.msra.mxu0 %v3374_v47  ;;  %v2052_v47 = vpack.c.bf16 %v2878_v45, %v2878_v45 }
 0x17a   : >> { %3103 = vmatpush3.bf16.msra.mxu1 %v3375_v48  ;;  %3082 = vmatprep.subr.bf16.mxu0 %v3376_v49  ;;  %v2054_v48 = vpack.c.bf16 %v2880_v46, %v2880_v46  ;;  %v2129_v49 = vshrl.u32 %v2053_v43, 16 }
 0x17b   : >> { %3104 = vmatprep.subr.bf16.mxu1 %v3377_v50  ;;  %v2131_v50 = vshll.u32 %v2053_v43, 16 }
 0x17d   : >> { %3083 = vmatpush3.bf16.msra.mxu0 %v3378_v51  ;;  %v2143_v51 = vshrl.u32 %v2055_v44, 16 }
 0x17e   : >> { %3105 = vmatpush3.bf16.msra.mxu1 %v3379_v52  ;;  %3084 = vmatprep.subr.bf16.mxu0 %v3380_v53  ;;  %v2145_v52 = vshll.u32 %v2055_v44, 16  ;;  %v2122_v53 = vshrl.u32 %v2052_v47, 16 }
 0x17f   : >> { %3106 = vmatprep.subr.bf16.mxu1 %v3381_v54  ;;  %v2124_v54 = vshll.u32 %v2052_v47, 16  ;;  %v2978_v47 = vld [vmem:[%s4256_s4] ss:$0 sm:$0xff] }
 0x181   : >> { %3085 = vmatpush3.bf16.msra.mxu0 %v3382_v55  ;;  %v2136_v55 = vshrl.u32 %v2054_v48, 16 }
 0x182   : >> { %3107 = vmatpush3.bf16.msra.mxu1 %v3383_v56  ;;  %3086 = vmatprep.subr.bf16.mxu0 %v3384_v57  ;;  %v2138_v56 = vshll.u32 %v2054_v48, 16  ;;  %v2133_v57 = vrot.slane %v2131_v50, 1 }
 0x183   : >> { %3108 = vmatprep.subr.bf16.mxu1 %v3385_v58  ;;  %v2147_v58 = vrot.slane %v2145_v52, 1 }
 0x185   : >> { %3087 = vmatpush3.bf16.msra.mxu0 %v3386_v59  ;;  %v2126_v59 = vrot.slane %v2124_v54, 1 }
 0x186   : >> { %3109 = vmatpush3.bf16.msra.mxu1 %v3387_v60  ;;  %3088 = vmatprep.subr.bf16.mxu0 %v3388_v61  ;;  %v2140_v60 = vrot.slane %v2138_v56, 1  ;;  %v2134_v61 = vor.u32 %v2133_v57, %v2129_v49 }
 0x187   : >> { %3110 = vmatprep.subr.bf16.mxu1 %v3389_v62  ;;  %v2148_v62 = vor.u32 %v2147_v58, %v2143_v51 }
 0x189   : >> { %3089 = vmatpush3.bf16.msra.mxu0 %v3390_v63  ;;  %v2127_v63 = vor.u32 %v2126_v59, %v2122_v53 }
 0x18a   : >> { %3111 = vmatpush3.bf16.msra.mxu1 %v3391_v0  ;;  %3118 = vmatprep.subr.bf16.mxu0 %v3392_v9  ;;  %v2141_v0 = vor.u32 %v2140_v60, %v2136_v55 }
 0x18b   : >> { %3140 = vmatprep.subr.bf16.mxu1 %v3393_v10 }
 0x18c   : >> { %2000 = vmatmul.mubr.bf16.vlgmr.msra.gmra.mrb[8].mxu0 %v1706_v7 }
 0x18d   : >> { %2040 = vmatmul.mubr.bf16.vlgmr.msra.gmra.mrb[8].mxu1 %v1708_v8  ;;  %3119 = vmatpush3.bf16.msra.mxu0 %v3394_v11 }
 0x18e   : >> { %3141 = vmatpush3.bf16.msra.mxu1 %v3395_v12  ;;  %3120 = vmatprep.subr.bf16.mxu0 %v3396_v13 }
 0x18f   : >> { %3142 = vmatprep.subr.bf16.mxu1 %v3397_v14  ;;  %2377 = vmatprep.mubr.bf16.mxu0 %v2134_v61 }
 0x190   : >> { %2417 = vmatprep.mubr.bf16.mxu1 %v2148_v62 }
 0x191   : >> { %3121 = vmatpush3.bf16.msra.mxu0 %v3398_v15 }
 0x192   : >> { %3143 = vmatpush3.bf16.msra.mxu1 %v3399_v16  ;;  %3122 = vmatprep.subr.bf16.mxu0 %v3400_v17 }
 0x193   : >> { %3144 = vmatprep.subr.bf16.mxu1 %v3401_v18 }
 0x195   : >> { %3123 = vmatpush3.bf16.msra.mxu0 %v3402_v19 }
 0x196   : >> { %3145 = vmatpush3.bf16.msra.mxu1 %v3403_v20  ;;  %3124 = vmatprep.subr.bf16.mxu0 %v3404_v21 }
 0x197   : >> { %3146 = vmatprep.subr.bf16.mxu1 %v3405_v22 }
 0x199   : >> { %3125 = vmatpush3.bf16.msra.mxu0 %v3406_v23 }
 0x19a   : >> { %3147 = vmatpush3.bf16.msra.mxu1 %v3407_v24  ;;  %3126 = vmatprep.subr.bf16.mxu0 %v3408_v25 }
 0x19b   : >> { %3148 = vmatprep.subr.bf16.mxu1 %v3409_v26 }
 0x19d   : >> { %3127 = vmatpush3.bf16.msra.mxu0 %v3410_v27 }
 0x19e   : >> { %3149 = vmatpush3.bf16.msra.mxu1 %v3411_v28  ;;  %3128 = vmatprep.subr.bf16.mxu0 %v3412_v29 }
 0x19f   : >> { %3150 = vmatprep.subr.bf16.mxu1 %v3413_v30 }
 0x1a1   : >> { %3129 = vmatpush3.bf16.msra.mxu0 %v3414_v31 }
 0x1a2   : >> { %3151 = vmatpush3.bf16.msra.mxu1 %v3415_v32  ;;  %3130 = vmatprep.subr.bf16.mxu0 %v3416_v33 }
 0x1a3   : >> { %3152 = vmatprep.subr.bf16.mxu1 %v3417_v34 }
 0x1a5   : >> { %3131 = vmatpush3.bf16.msra.mxu0 %v3418_v35 }
 0x1a6   : >> { %3153 = vmatpush3.bf16.msra.mxu1 %v3419_v36  ;;  %3132 = vmatprep.subr.bf16.mxu0 %v3420_v37 }
 0x1a7   : >> { %3154 = vmatprep.subr.bf16.mxu1 %v3421_v38 }
 0x1a9   : >> { %3133 = vmatpush3.bf16.msra.mxu0 %v3422_v39 }
 0x1aa   : >> { %3155 = vmatpush3.bf16.msra.mxu1 %v3423_v40 }
 0x1ac   : >> { %2378 = vmatmul.mubr.bf16.vlgmr.msra.gmra.mrb[12].mxu0 %v2127_v63 }
 0x1ad   : >> { %2418 = vmatmul.mubr.bf16.vlgmr.msra.gmra.mrb[12].mxu1 %v2141_v0 }
 0x21f   : >> { %v3002_v1 = vpop.f32.mrb[0].mxu0 }
 0x220   : >> { %v3024_v2 = vpop.f32.mrb[0].mxu1  ;;  %v3003_v3 = vpop.f32.mrb[1].mxu0 }
 0x221   : >> { %v3025_v4 = vpop.f32.mrb[1].mxu1  ;;  %v3004_v5 = vadd.f32 %v3003_v3, %v3002_v1  ;;  %v3005_v7 = vpop.f32.mrb[2].mxu0 }
 0x222   : >> { %v3026_v6 = vadd.f32 %v3025_v4, %v3024_v2  ;;  %v3027_v8 = vpop.f32.mrb[2].mxu1  ;;  %v3006_v9 = vpop.f32.mrb[3].mxu0 }
 0x223   : >> { %v3028_v10 = vpop.f32.mrb[3].mxu1 }
 0x224   : >> { %v1421_v11 = vadd.f32 %v3026_v6, %v3004_v5 }
 0x23f   : >> { %v3046_v12 = vpop.f32.mrb[4].mxu0 }
 0x240   : >> { %v3068_v13 = vpop.f32.mrb[4].mxu1  ;;  %v3047_v14 = vpop.f32.mrb[5].mxu0 }
 0x241   : >> { %v3069_v15 = vpop.f32.mrb[5].mxu1  ;;  %v3048_v16 = vadd.f32 %v3047_v14, %v3046_v12  ;;  %v3049_v18 = vpop.f32.mrb[6].mxu0 }
 0x242   : >> { %v3070_v17 = vadd.f32 %v3069_v15, %v3068_v13  ;;  %v3071_v19 = vpop.f32.mrb[6].mxu1  ;;  %v3050_v20 = vpop.f32.mrb[7].mxu0 }
 0x243   : >> { %v3072_v21 = vpop.f32.mrb[7].mxu1  ;;  %v1653_v22 = vadd.f32 %v3048_v16, %v1421_v11 }
 0x245   : >> { %v1693_v23 = vadd.f32 %v3070_v17, %v1653_v22 }
 0x25f   : >> { %v3090_v24 = vpop.f32.mrb[8].mxu0 }
 0x260   : >> { %v3112_v25 = vpop.f32.mrb[8].mxu1  ;;  %v3091_v26 = vpop.f32.mrb[9].mxu0 }
 0x261   : >> { %v3113_v27 = vpop.f32.mrb[9].mxu1  ;;  %v3092_v28 = vadd.f32 %v3091_v26, %v3090_v24  ;;  %v3093_v30 = vpop.f32.mrb[10].mxu0 }
 0x262   : >> { %v3114_v29 = vadd.f32 %v3113_v27, %v3112_v25  ;;  %v3115_v31 = vpop.f32.mrb[10].mxu1  ;;  %v3094_v32 = vpop.f32.mrb[11].mxu0 }
 0x263   : >> { %v3116_v33 = vpop.f32.mrb[11].mxu1 }
 0x264   : >> { %v2042_v34 = vadd.f32 %v3114_v29, %v3092_v28 }
 0x266   : >> { %v2047_v35 = vadd.f32 %v2042_v34, %v1693_v23 }
 0x27f   : >> { %v3134_v36 = vpop.f32.mrb[12].mxu0 }
 0x280   : >> { %v3156_v37 = vpop.f32.mrb[12].mxu1  ;;  %v3135_v38 = vpop.f32.mrb[13].mxu0 }
 0x281   : >> { %v3157_v39 = vpop.f32.mrb[13].mxu1  ;;  %v3136_v40 = vadd.f32 %v3135_v38, %v3134_v36  ;;  %v3137_v42 = vpop.f32.mrb[14].mxu0 }
 0x282   : >> { %v3158_v41 = vadd.f32 %v3157_v39, %v3156_v37  ;;  %v3159_v43 = vpop.f32.mrb[14].mxu1  ;;  %v3138_v44 = vpop.f32.mrb[15].mxu0 }
 0x283   : >> { %v3160_v45 = vpop.f32.mrb[15].mxu1 }
 0x284   : >> { %v2420_v46 = vadd.f32 %v3158_v41, %v3136_v40 }
 0x286   : >> { %v2425_v48 = vadd.f32 %v2420_v46, %v2047_v35  ;;  %972 = sbr.rel (!%p970_p12) target bundleno = 298 (0x12a), region = 112 }
 0x288   : >> { %v2433_v49 = vadd.f32 %v2978_v47, %v2425_v48 }
 0x28a   : >> { %v2434_v50 = vmax.f32 %v2433_v49, 0.0 }
 0x28c   : >> { %2436 = vst [vmem:[%s2435_s8] sm:$0xf] %v2434_v50 }
 0x28d   : > { %3437 = shalt.err (!%p3434_p7)
}
 0x28e   : > { %s3438_s6 = scalar_lea.hbm %s4203_s13, 256  ;;  %s3442_s17 = scalar_lea.hbm %s4257_s5, 512 }
 0x28f   : > { %p3439_p8 = scmp.ne.s32.totalorder %s4203_s13, %s3438_s6  ;;  %p3443_p11 = scmp.lt.u32.totalorder %s4203_s13, %s4257_s5 }
 0x290   : > { %p3444_p12 = scmp.lt.u32.totalorder %s3442_s17, %s3438_s6  ;;  %p3446_p0 = scmp.lt.u32.totalorder %s3438_s6, %s4203_s13 }
 0x291   : > { %p3440_p9 = pnand %p3439_p8, %p3577_p5 }
 0x292   : > { %p3445_p13 = por %p3444_p12, %p3443_p11 }
 0x293   : > { %p3441_p10 = pneg %p3440_p9 }
 0x294   : > { %p3447_p1 = por %p3446_p0, %p3445_p13 }
 0x296   : > { %p3448_p2 = pnand %p3447_p1, %p3441_p10 }
 0x298   : > { %3451 = shalt.err (!%p3448_p2)
}
 0x299   : > { %s3507_s25 = smov 64   ;;  %s3508_s7 = smov 4  }
 0x29a   : > { %3163 = dma.vmem_to_hbm [thread:$0]  (%p3577_p5), %s4207_s30, 256, %s4203_s13, %s4211_s15, %s3507_s25, %s3507_s25, %s3508_s7  }
 0x29b PF: > { %p3169_p3 = scmp.ge.s32.totalorder %s3494_s21, 2  ;;  %s2466_s11 = sand.u32 1, %s3482_s18  }
 0x29c   : > { %s2467_s26 = scalar_lea.sflag [#allocation4], %s2466_s11 }
 0x29d   : > { %p3166_p4 = pnand %p3169_p3, %p3581_p6 }
 0x29f   : > { %3477 = dma.done.wait (!%p3166_p4), %s2467_s26, 256  }
 0x2a0   : > { %3479 = vsyncadd (!%p3166_p4), %s2467_s26, 4294967040  ;;  %p15_p7 = scmp.ge.s32.totalorder %s3564_s24, 4   ;;  %s4262_s18 = smov %s3486_s19 }
 0x2a1   : > { %s4263_s19 = smov %s3490_s20  ;;  %s4264_s20 = smov %s3575_s27 }
 0x2a2   : > { %s4265_s21 = smov %s3564_s24  ;;  %17 = sbr.rel (!%p15_p7) target bundleno = 3 (0x3), region = 123 }
 0x2a9   :  { %2472 = vsyncpa [#allocation4], 1 }
 0x2aa   :  { %2474 = vsyncpa [#allocation4 + $0x1], 1 }

</bundles_post_ra>
